<compile_context>
chip_gen: v5e
topology: v5e:2x2
jax: 0.10.0
libtpu: 0.0.40
codegen_flags: <defaults>
</compile_context>

<pallas_src>
from functools import partial

import jax
import jax.numpy as jnp
import numpy as np
from jax.experimental import pallas as pl
from jax.experimental.pallas import tpu as pltpu

EPS = 1e-5  # torch.nn.LayerNorm default


# ---------------------------------------------------------------------------
# layout glue (pure permutations; exact replicas of torch block/unblock/to2d/to3d)
# TODO(synk): fold these XLA-side permutations into the kernel (DMA the
# contiguous (B, Ntok, C) slab and relayout in VMEM) at production sizes.
# ---------------------------------------------------------------------------
def _to3d(t):
    # (B, N, C) -> (B, C, H, W)
    B, N, C = t.shape
    H = int(round(N ** 0.5))
    return jnp.transpose(t.reshape(B, H, H, C), (0, 3, 1, 2))


def _to2d(t):
    # (B, C, H, W) -> (B, H*W, C)
    B, C, H, W = t.shape
    return jnp.transpose(t.reshape(B, C, H * W), (0, 2, 1))


def _block(t, p):
    # (B, C, H, W) -> (B, (H*W)//p^2, p^2, C)
    B, C, H, W = t.shape
    t = t.reshape(B, C, p, H // p, p, W // p)
    return jnp.transpose(t, (0, 3, 5, 2, 4, 1)).reshape(B, (H * W) // (p * p), p * p, C)


def _unblock(t):
    # (B, M, N, C) -> (B, C, H, W)
    B, M, N, C = t.shape
    Hm = int(round(M ** 0.5))
    p = int(round(N ** 0.5))
    t = t.reshape(B, Hm, Hm, p, p, C)
    return jnp.transpose(t, (0, 5, 3, 1, 4, 2)).reshape(B, C, Hm * p, Hm * p)


# ---------------------------------------------------------------------------
# fused Pallas kernel: norm1 -> MultiAxisAttention -> +res -> norm2 -> MLP -> +res
# ---------------------------------------------------------------------------
def _maa_block_kernel(num_heads,
                      x_ref, g1_ref, b1_ref, wb1_ref, wb2_ref,
                      g2_ref, b2_ref, w1t_ref, mb1_ref, w2t_ref, mb2_ref,
                      o_ref):
    _, M, P, C = x_ref.shape
    T = M * P
    h1 = (num_heads + 1) // 2          # torch `Q.chunk(2, dim=1)` head split
    h2 = num_heads - h1

    x = x_ref[0]                        # (M, P, C) f32

    def layernorm(v, g, b):             # f32 statistics (VPU)
        mu = jnp.mean(v, axis=-1, keepdims=True)
        var = jnp.mean(jnp.square(v - mu), axis=-1, keepdims=True)
        return (v - mu) * jax.lax.rsqrt(var + EPS) * g + b

    def softmax(v):                     # f32, EUP reciprocal for the divide
        m = jnp.max(v, axis=-1, keepdims=True)
        e = jnp.exp(v - m)
        return e * pl.reciprocal(jnp.sum(e, axis=-1, keepdims=True), approx=True)

    # ---- norm1, once, on the natural (M, P, C) layout ----------------------
    xn = layernorm(x.reshape(T, C), g1_ref[...], b1_ref[...])           # (T, C) f32
    xn_bf = xn.astype(jnp.bfloat16)
    # (P, M, C) token order for the "across-grid" branch: derived once in VMEM
    # (C stays in lanes -> sublane-only relayout), no second LayerNorm, no DMA.
    xn_pm_bf = (pltpu.einshape("abc->bac", xn.reshape(M, P, C))
                .reshape(T, C).astype(jnp.bfloat16))

    # ---- packed projections: one wide MXU matmul per token order -----------
    # wb2 = [K | Q_{h1..H-1} | VS_{h1..H-1}]   (tokens in (m, p) order)
    # wb1 = [K | Q_{0..h1-1}  | VS_{0..h1-1}]  (tokens in (p, m) order)
    # bf16 operands, f32 accumulation.  K is recomputed in both orders; that
    # marginal MXU work is cheaper than the (M,P,C)->(P,M,C) XLU transpose.
    proj2 = jnp.dot(xn_bf, wb2_ref[...], preferred_element_type=jnp.float32)
    proj1 = jnp.dot(xn_pm_bf, wb1_ref[...], preferred_element_type=jnp.float32)

    # slices are static, done in f32 (well-supported path), then cast to bf16
    k2 = proj2[:, 0:C].astype(jnp.bfloat16).reshape(M, P, C)   # K, (m, p) order
    k1 = proj1[:, 0:C].astype(jnp.bfloat16).reshape(P, M, C)   # K, (p, m) order

    # ---- branch 1: heads [0, h1) attend across the M ("grid") axis ----------
    # (static Python loop is fine here: per-head q/vs/logits/sc are small and
    #  the big projection work is already fused above; H is small.)
    z1 = jnp.zeros((P, M, C), jnp.float32)
    for j in range(h1):
        q = proj1[:, (1 + j) * C:(2 + j) * C].astype(jnp.bfloat16).reshape(P, M, C)
        vs = proj1[:, (1 + h1 + j) * C:(2 + h1 + j) * C].astype(jnp.bfloat16).reshape(P, M, C)
        logits = jnp.einsum('pxk,pzk->pxz', q, k1,
                            preferred_element_type=jnp.float32)
        sc = softmax(logits).astype(jnp.bfloat16)               # (P, M, M)
        z1 = z1 + jnp.einsum('pxz,pzv->pxv', sc, vs,
                             preferred_element_type=jnp.float32)

    # ---- branch 2: heads [h1, H) attend across the P ("intra-patch") axis ---
    z2 = jnp.zeros((M, P, C), jnp.float32)
    for j in range(h2):
        q = proj2[:, (1 + j) * C:(2 + j) * C].astype(jnp.bfloat16).reshape(M, P, C)
        vs = proj2[:, (1 + h2 + j) * C:(2 + h2 + j) * C].astype(jnp.bfloat16).reshape(M, P, C)
        logits = jnp.einsum('myk,mzk->myz', q, k2,
                            preferred_element_type=jnp.float32)
        sc = softmax(logits).astype(jnp.bfloat16)               # (M, P, P)
        z2 = z2 + jnp.einsum('myz,mzv->myv', sc, vs,
                             preferred_element_type=jnp.float32)

    # ---- combine both branches in VMEM + residual 1 --------------------------
    # Single f32 (P,M,C)->(M,P,C) relayout per grid step; transposing per-head
    # outputs instead would cost h1 relayouts, so this stays.
    z = z2 + pltpu.einshape("abc->bac", z1)                     # (M, P, C)
    x1 = x.reshape(T, C) + z.reshape(T, C)                      # (T, C) f32

    # ---- norm2 + MLP + residual 2 (per-token ops commute with the blocked
    #      permutation, so the whole tail runs fused in blocked layout) -------
    xn2 = layernorm(x1, g2_ref[...], b2_ref[...]).astype(jnp.bfloat16)
    hid = jnp.dot(xn2, w1t_ref[...], preferred_element_type=jnp.float32) + mb1_ref[...]
    hid = jnp.maximum(hid, 0.0).astype(jnp.bfloat16)
    y = jnp.dot(hid, w2t_ref[...], preferred_element_type=jnp.float32) + mb2_ref[...]

    # TODO(synk): with C < 128 (toy dims only) the output stores are
    # lane-masked; a lane-dense (M, P*C) out_spec would need an in-kernel
    # sublane->lane merge relayout.  Production HiT dims (C >= 128) are
    # already lane-dense, so the relayout is left out for lowering safety.
    o_ref[0] = (x1 + y).reshape(M, P, C)


# ---------------------------------------------------------------------------
# wrapper
# ---------------------------------------------------------------------------
def _pick_vmem_limit():
    """Generation-dependent VMEM budget (review item): 128-MiB parts get 96 MiB,
    v7x-class (64 MiB physical) gets 48 MiB, unknown parts a conservative 32 MiB."""
    try:
        kind = jax.devices()[0].device_kind.lower()
    except Exception:
        return 32 * 1024 * 1024
    if ("v5" in kind) or ("v6" in kind):
        return 96 * 1024 * 1024
    if "v7" in kind:
        return 48 * 1024 * 1024
    return 32 * 1024 * 1024


def maa_block_forward(x, params, num_heads, patch_size):
    B, Ntok, C = x.shape
    Hsp = int(round(Ntok ** 0.5))
    p = patch_size
    M = (Hsp // p) * (Hsp // p)
    P = p * p
    assert num_heads >= 2, "multi-axis attention needs at least 2 heads"

    h1 = (num_heads + 1) // 2
    h2 = num_heads - h1

    x_blk = _block(_to3d(x), p)                               # (B, M, P, C) f32

    # output projection 'bhmnd,hdv->bmnd' keeps d and sums over v (matches the
    # torch MAABlock einsum), so it collapses to a per-head, per-channel scale
    # o[h].sum(-1); fold it into the V weights so it rides the MXU pass.
    osum = jnp.sum(params['o'], axis=-1)                      # (H, C)
    vsw = params['v'][None, :, :] * osum[:, None, :]          # (H, C, C)

    wdt = jnp.bfloat16                                        # bf16 weights, f32 accumulation
    # Packed projection matrices (one per token order): [K | Q heads | VS heads]
    wb1 = jnp.concatenate([params['k']]
                          + [params['q'][h] for h in range(h1)]
                          + [vsw[h] for h in range(h1)], axis=1).astype(wdt)
    wb2 = jnp.concatenate([params['k']]
                          + [params['q'][h] for h in range(h1, num_heads)]
                          + [vsw[h] for h in range(h1, num_heads)], axis=1).astype(wdt)
    w1t = params['w1'].T.astype(wdt)
    w2t = params['w2'].T.astype(wdt)

    def full(shape):
        # constant-index weight blocks: never re-DMA'd across the batch grid.
        # TODO(synk): at production dims on v7x, add pipeline_mode=pl.Buffered(1)
        # (or a run_scoped copy) so the large packed weights are not double-buffered.
        return pl.BlockSpec(shape, lambda b, _n=len(shape): (0,) * _n)

    out_blk = pl.pallas_call(
        partial(_maa_block_kernel, num_heads),
        grid=(B,),
        in_specs=[
            pl.BlockSpec((1, M, P, C), lambda b: (b, 0, 0, 0)),   # x (blocked layout)
            full((1, C)), full((1, C)),                           # norm1 gamma / beta
            full((C, (1 + 2 * h1) * C)),                          # packed [K|Q|VS], (p,m) branch
            full((C, (1 + 2 * h2) * C)),                          # packed [K|Q|VS], (m,p) branch
            full((1, C)), full((1, C)),                           # norm2 gamma / beta
            full((C, C)), full((1, C)),                           # W1^T, b1
            full((C, C)), full((1, C)),                           # W2^T, b2
        ],
        out_specs=pl.BlockSpec((1, M, P, C), lambda b: (b, 0, 0, 0)),
        out_shape=jax.ShapeDtypeStruct((B, M, P, C), jnp.float32),
        compiler_params=pltpu.CompilerParams(
            dimension_semantics=("parallel",),    # batch shards across v7x's 2 TCs
            vmem_limit_bytes=_pick_vmem_limit(),
        ),
    )(x_blk,
      params['ln1_g'].reshape(1, C), params['ln1_b'].reshape(1, C),
      wb1, wb2,
      params['ln2_g'].reshape(1, C), params['ln2_b'].reshape(1, C),
      w1t, params['b1'].reshape(1, C),
      w2t, params['b2'].reshape(1, C))

    return _to2d(_unblock(out_blk))


# ---------------------------------------------------------------------------
# pure-JAX reference (mirrors the torch module literally, for validation)
# ---------------------------------------------------------------------------
def reference_forward(x, params, num_heads, patch_size):
    def ln(t, g, b):
        mu = t.mean(-1, keepdims=True)
        var = ((t - mu) ** 2).mean(-1, keepdims=True)
        return (t - mu) / jnp.sqrt(var + EPS) * g + b

    xb = _block(_to3d(ln(x, params['ln1_g'], params['ln1_b'])), patch_size)
    Q = jnp.einsum('bmnd,hdk->bhmnk', xb, params['q'])
    h1 = (num_heads + 1) // 2                       # torch chunk(2, dim=1)
    Q1, Q2 = Q[:, :h1], Q[:, h1:]
    K = jnp.einsum('bmnd,dk->bmnk', xb, params['k'])
    V = jnp.einsum('bmnd,dv->bmnv', xb, params['v'])
    logits = jnp.einsum('bhxyk,bzyk->bhyxz', Q1, K)
    O1 = jnp.einsum('bhyxz,bzyv->bhxyv', jax.nn.softmax(logits, -1), V)
    logits = jnp.einsum('bhxyk,bxzk->bhxyz', Q2, K)
    O2 = jnp.einsum('bhxyz,bxzv->bhxyv', jax.nn.softmax(logits, -1), V)
    O = jnp.concatenate([O1, O2], axis=1)
    Z = jnp.einsum('bhmnd,hdv->bmnd', O, params['o'])
    x = x + _to2d(_unblock(Z))
    xn = ln(x, params['ln2_g'], params['ln2_b'])
    h = jax.nn.relu(xn @ params['w1'].T + params['b1'])
    return x + (h @ params['w2'].T + params['b2'])


# ---------------------------------------------------------------------------
if __name__ == "__main__":
    B, dim, num_heads, patch_size, Hsp = 2, 32, 2, 4, 8
    Ntok = Hsp * Hsp

    key = jax.random.PRNGKey(0)
    ks = jax.random.split(key, 10)
    params = {
        'ln1_g': jnp.ones((dim,), jnp.float32),
        'ln1_b': jnp.zeros((dim,), jnp.float32),
        'ln2_g': jnp.ones((dim,), jnp.float32),
        'ln2_b': jnp.zeros((dim,), jnp.float32),
        'q': 0.1 * jax.random.normal(ks[0], (num_heads, dim, dim), jnp.float32),
        'k': 0.1 * jax.random.normal(ks[1], (dim, dim), jnp.float32),
        'v': 0.1 * jax.random.normal(ks[2], (dim, dim), jnp.float32),
        'o': 0.1 * jax.random.normal(ks[3], (num_heads, dim, dim), jnp.float32),
        'w1': 0.1 * jax.random.normal(ks[4], (dim, dim), jnp.float32),
        'b1': 0.1 * jax.random.normal(ks[5], (dim,), jnp.float32),
        'w2': 0.1 * jax.random.normal(ks[6], (dim, dim), jnp.float32),
        'b2': 0.1 * jax.random.normal(ks[7], (dim,), jnp.float32),
    }
    x = jax.random.normal(ks[8], (B, Ntok, dim), jnp.float32)

    fwd = jax.jit(partial(maa_block_forward, num_heads=num_heads, patch_size=patch_size))
    out = jax.block_until_ready(fwd(x, params))
    assert out.shape == (B, Ntok, dim)
    assert bool(jnp.all(jnp.isfinite(out)))

    ref = reference_forward(x, params, num_heads, patch_size)
    # bf16 MXU operands (projections, QK^T, PV, MLP) vs the f32 reference.
    np.testing.assert_allclose(np.asarray(out), np.asarray(ref), atol=4e-2, rtol=4e-2)

    print("KERNEL_OK")
</pallas_src>

<mosaic_0001>
module attributes {stable_mosaic.version = 11 : i64} {
  func.func @_maa_block_kernel(%arg0: i32, %arg1: memref<1x4x16x32xf32, #tpu.memory_space<vmem>>, %arg2: memref<1x32xf32, #tpu.memory_space<vmem>>, %arg3: memref<1x32xf32, #tpu.memory_space<vmem>>, %arg4: memref<32x96xbf16, #tpu.memory_space<vmem>>, %arg5: memref<32x96xbf16, #tpu.memory_space<vmem>>, %arg6: memref<1x32xf32, #tpu.memory_space<vmem>>, %arg7: memref<1x32xf32, #tpu.memory_space<vmem>>, %arg8: memref<32x32xbf16, #tpu.memory_space<vmem>>, %arg9: memref<1x32xf32, #tpu.memory_space<vmem>>, %arg10: memref<32x32xbf16, #tpu.memory_space<vmem>>, %arg11: memref<1x32xf32, #tpu.memory_space<vmem>>, %arg12: memref<1x4x16x32xf32, #tpu.memory_space<vmem>>) attributes {dimension_semantics = [#tpu.dimension_semantics<parallel>], iteration_bounds = array<i64: 2>, scalar_prefetch = 0 : i64, scratch_operands = 0 : i64, tpu.core_type = #tpu.core_type<tc>, window_params = [{transform_indices = @transform_0, window_bounds = array<i64: 1, 4, 16, 32>}, {pipeline_mode = #tpu.pipeline_mode<synchronous>, transform_indices = @transform_1, window_bounds = array<i64: 1, 32>}, {pipeline_mode = #tpu.pipeline_mode<synchronous>, transform_indices = @transform_2, window_bounds = array<i64: 1, 32>}, {pipeline_mode = #tpu.pipeline_mode<synchronous>, transform_indices = @transform_3, window_bounds = array<i64: 32, 96>}, {pipeline_mode = #tpu.pipeline_mode<synchronous>, transform_indices = @transform_4, window_bounds = array<i64: 32, 96>}, {pipeline_mode = #tpu.pipeline_mode<synchronous>, transform_indices = @transform_5, window_bounds = array<i64: 1, 32>}, {pipeline_mode = #tpu.pipeline_mode<synchronous>, transform_indices = @transform_6, window_bounds = array<i64: 1, 32>}, {pipeline_mode = #tpu.pipeline_mode<synchronous>, transform_indices = @transform_7, window_bounds = array<i64: 32, 32>}, {pipeline_mode = #tpu.pipeline_mode<synchronous>, transform_indices = @transform_8, window_bounds = array<i64: 1, 32>}, {pipeline_mode = #tpu.pipeline_mode<synchronous>, transform_indices = @transform_9, window_bounds = array<i64: 32, 32>}, {pipeline_mode = #tpu.pipeline_mode<synchronous>, transform_indices = @transform_10, window_bounds = array<i64: 1, 32>}, {transform_indices = @transform_11, window_bounds = array<i64: 1, 4, 16, 32>}]} {
    %c0 = arith.constant 0 : index
    %c0_0 = arith.constant 0 : index
    %c0_1 = arith.constant 0 : index
    %c0_2 = arith.constant 0 : index
    %0 = vector.load %arg1[%c0, %c0_0, %c0_1, %c0_2] : memref<1x4x16x32xf32, #tpu.memory_space<vmem>>, vector<1x4x16x32xf32>
    %1 = vector.shape_cast %0 : vector<1x4x16x32xf32> to vector<4x16x32xf32>
    %2 = vector.shape_cast %1 : vector<4x16x32xf32> to vector<64x32xf32>
    %c0_3 = arith.constant 0 : index
    %c0_4 = arith.constant 0 : index
    %3 = vector.load %arg2[%c0_3, %c0_4] : memref<1x32xf32, #tpu.memory_space<vmem>>, vector<1x32xf32>
    %c0_5 = arith.constant 0 : index
    %c0_6 = arith.constant 0 : index
    %4 = vector.load %arg3[%c0_5, %c0_6] : memref<1x32xf32, #tpu.memory_space<vmem>>, vector<1x32xf32>
    %cst = arith.constant dense<0.000000e+00> : vector<64xf32>
    %5 = vector.multi_reduction <add>, %2, %cst [1] : vector<64x32xf32> to vector<64xf32>
    %6 = vector.shape_cast %5 : vector<64xf32> to vector<64x1xf32>
    %cst_7 = arith.constant 3.200000e+01 : f32
    %7 = vector.broadcast %cst_7 : f32 to vector<64x1xf32>
    %8 = arith.divf %6, %7 : vector<64x1xf32>
    %9 = vector.broadcast %8 : vector<64x1xf32> to vector<64x32xf32>
    %10 = arith.subf %2, %9 : vector<64x32xf32>
    %11 = arith.mulf %10, %10 : vector<64x32xf32>
    %cst_8 = arith.constant dense<0.000000e+00> : vector<64xf32>
    %12 = vector.multi_reduction <add>, %11, %cst_8 [1] : vector<64x32xf32> to vector<64xf32>
    %13 = vector.shape_cast %12 : vector<64xf32> to vector<64x1xf32>
    %cst_9 = arith.constant 3.200000e+01 : f32
    %14 = vector.broadcast %cst_9 : f32 to vector<64x1xf32>
    %15 = arith.divf %13, %14 : vector<64x1xf32>
    %16 = vector.broadcast %8 : vector<64x1xf32> to vector<64x32xf32>
    %17 = arith.subf %2, %16 : vector<64x32xf32>
    %cst_10 = arith.constant 9.99999974E-6 : f32
    %18 = vector.broadcast %cst_10 : f32 to vector<64x1xf32>
    %19 = arith.addf %15, %18 : vector<64x1xf32>
    %20 = math.rsqrt %19 : vector<64x1xf32>
    %21 = vector.broadcast %20 : vector<64x1xf32> to vector<64x32xf32>
    %22 = arith.mulf %17, %21 : vector<64x32xf32>
    %23 = vector.broadcast %3 : vector<1x32xf32> to vector<64x32xf32>
    %24 = arith.mulf %22, %23 : vector<64x32xf32>
    %25 = vector.broadcast %4 : vector<1x32xf32> to vector<64x32xf32>
    %26 = arith.addf %24, %25 : vector<64x32xf32>
    %27 = arith.truncf %26 : vector<64x32xf32> to vector<64x32xbf16>
    %28 = vector.shape_cast %26 : vector<64x32xf32> to vector<4x16x32xf32>
    %29 = tpu.transpose %28, [1, 0, 2] : vector<4x16x32xf32> -> vector<16x4x32xf32>
    %30 = vector.shape_cast %29 : vector<16x4x32xf32> to vector<64x32xf32>
    %31 = arith.truncf %30 : vector<64x32xf32> to vector<64x32xbf16>
    %c0_11 = arith.constant 0 : index
    %c0_12 = arith.constant 0 : index
    %32 = vector.load %arg5[%c0_11, %c0_12] : memref<32x96xbf16, #tpu.memory_space<vmem>>, vector<32x96xbf16>
    %cst_13 = arith.constant dense<0.000000e+00> : vector<64x96xf32>
    %33 = tpu.matmul %27, %32, %cst_13 {dimension_numbers = #tpu.dot_dimension_numbers<[1], [0], [0], [1], [0, 0, 1, 1], [], []>} : vector<64x32xbf16>, vector<32x96xbf16>, vector<64x96xf32> -> vector<64x96xf32>
    %c0_14 = arith.constant 0 : index
    %c0_15 = arith.constant 0 : index
    %34 = vector.load %arg4[%c0_14, %c0_15] : memref<32x96xbf16, #tpu.memory_space<vmem>>, vector<32x96xbf16>
    %cst_16 = arith.constant dense<0.000000e+00> : vector<64x96xf32>
    %35 = tpu.matmul %31, %34, %cst_16 {dimension_numbers = #tpu.dot_dimension_numbers<[1], [0], [0], [1], [0, 0, 1, 1], [], []>} : vector<64x32xbf16>, vector<32x96xbf16>, vector<64x96xf32> -> vector<64x96xf32>
    %36 = vector.extract_strided_slice %33 {offsets = [0, 0], sizes = [64, 32], strides = [1, 1]} : vector<64x96xf32> to vector<64x32xf32>
    %37 = arith.truncf %36 : vector<64x32xf32> to vector<64x32xbf16>
    %38 = vector.shape_cast %37 : vector<64x32xbf16> to vector<4x16x32xbf16>
    %39 = vector.extract_strided_slice %35 {offsets = [0, 0], sizes = [64, 32], strides = [1, 1]} : vector<64x96xf32> to vector<64x32xf32>
    %40 = arith.truncf %39 : vector<64x32xf32> to vector<64x32xbf16>
    %41 = vector.shape_cast %40 : vector<64x32xbf16> to vector<16x4x32xbf16>
    %cst_17 = arith.constant 0.000000e+00 : f32
    %42 = vector.broadcast %cst_17 : f32 to vector<16x4x32xf32>
    %43 = vector.extract_strided_slice %35 {offsets = [0, 32], sizes = [64, 32], strides = [1, 1]} : vector<64x96xf32> to vector<64x32xf32>
    %44 = arith.truncf %43 : vector<64x32xf32> to vector<64x32xbf16>
    %45 = vector.shape_cast %44 : vector<64x32xbf16> to vector<16x4x32xbf16>
    %46 = vector.extract_strided_slice %35 {offsets = [0, 64], sizes = [64, 32], strides = [1, 1]} : vector<64x96xf32> to vector<64x32xf32>
    %47 = arith.truncf %46 : vector<64x32xf32> to vector<64x32xbf16>
    %48 = vector.shape_cast %47 : vector<64x32xbf16> to vector<16x4x32xbf16>
    "tpu.trace_start"() <{level = 10 : i32, message = "pxk,pzk->pxz"}> : () -> ()
    %cst_18 = arith.constant dense<0.000000e+00> : vector<16x4x4xf32>
    %49 = tpu.matmul %45, %41, %cst_18 {dimension_numbers = #tpu.dot_dimension_numbers<[2], [2], [1], [1], [0, 0, 0, 1, 1, 1], [0], [0]>} : vector<16x4x32xbf16>, vector<16x4x32xbf16>, vector<16x4x4xf32> -> vector<16x4x4xf32>
    "tpu.trace_stop"() : () -> ()
    %cst_19 = arith.constant dense<0xFF800000> : vector<16x4xf32>
    %50 = vector.multi_reduction <maximumf>, %49, %cst_19 [2] : vector<16x4x4xf32> to vector<16x4xf32>
    %51 = vector.shape_cast %50 : vector<16x4xf32> to vector<16x4x1xf32>
    %52 = vector.broadcast %51 : vector<16x4x1xf32> to vector<16x4x4xf32>
    %53 = arith.subf %49, %52 : vector<16x4x4xf32>
    %54 = math.exp %53 : vector<16x4x4xf32>
    %cst_20 = arith.constant dense<0.000000e+00> : vector<16x4xf32>
    %55 = vector.multi_reduction <add>, %54, %cst_20 [2] : vector<16x4x4xf32> to vector<16x4xf32>
    %56 = vector.shape_cast %55 : vector<16x4xf32> to vector<16x4x1xf32>
    %57 = tpu.reciprocal %56 {approx = true} : vector<16x4x1xf32> -> vector<16x4x1xf32>
    %58 = vector.broadcast %57 : vector<16x4x1xf32> to vector<16x4x4xf32>
    %59 = arith.mulf %54, %58 : vector<16x4x4xf32>
    %60 = arith.truncf %59 : vector<16x4x4xf32> to vector<16x4x4xbf16>
    "tpu.trace_start"() <{level = 10 : i32, message = "pxz,pzv->pxv"}> : () -> ()
    %cst_21 = arith.constant dense<0.000000e+00> : vector<16x4x32xf32>
    %61 = tpu.matmul %60, %48, %cst_21 {dimension_numbers = #tpu.dot_dimension_numbers<[2], [1], [1], [2], [0, 0, 0, 1, 1, 2], [0], [0]>} : vector<16x4x4xbf16>, vector<16x4x32xbf16>, vector<16x4x32xf32> -> vector<16x4x32xf32>
    "tpu.trace_stop"() : () -> ()
    %62 = arith.addf %42, %61 : vector<16x4x32xf32>
    %cst_22 = arith.constant 0.000000e+00 : f32
    %63 = vector.broadcast %cst_22 : f32 to vector<4x16x32xf32>
    %64 = vector.extract_strided_slice %33 {offsets = [0, 32], sizes = [64, 32], strides = [1, 1]} : vector<64x96xf32> to vector<64x32xf32>
    %65 = arith.truncf %64 : vector<64x32xf32> to vector<64x32xbf16>
    %66 = vector.shape_cast %65 : vector<64x32xbf16> to vector<4x16x32xbf16>
    %67 = vector.extract_strided_slice %33 {offsets = [0, 64], sizes = [64, 32], strides = [1, 1]} : vector<64x96xf32> to vector<64x32xf32>
    %68 = arith.truncf %67 : vector<64x32xf32> to vector<64x32xbf16>
    %69 = vector.shape_cast %68 : vector<64x32xbf16> to vector<4x16x32xbf16>
    "tpu.trace_start"() <{level = 10 : i32, message = "myk,mzk->myz"}> : () -> ()
    %cst_23 = arith.constant dense<0.000000e+00> : vector<4x16x16xf32>
    %70 = tpu.matmul %66, %38, %cst_23 {dimension_numbers = #tpu.dot_dimension_numbers<[2], [2], [1], [1], [0, 0, 0, 1, 1, 1], [0], [0]>} : vector<4x16x32xbf16>, vector<4x16x32xbf16>, vector<4x16x16xf32> -> vector<4x16x16xf32>
    "tpu.trace_stop"() : () -> ()
    %cst_24 = arith.constant dense<0xFF800000> : vector<4x16xf32>
    %71 = vector.multi_reduction <maximumf>, %70, %cst_24 [2] : vector<4x16x16xf32> to vector<4x16xf32>
    %72 = vector.shape_cast %71 : vector<4x16xf32> to vector<4x16x1xf32>
    %73 = vector.broadcast %72 : vector<4x16x1xf32> to vector<4x16x16xf32>
    %74 = arith.subf %70, %73 : vector<4x16x16xf32>
    %75 = math.exp %74 : vector<4x16x16xf32>
    %cst_25 = arith.constant dense<0.000000e+00> : vector<4x16xf32>
    %76 = vector.multi_reduction <add>, %75, %cst_25 [2] : vector<4x16x16xf32> to vector<4x16xf32>
    %77 = vector.shape_cast %76 : vector<4x16xf32> to vector<4x16x1xf32>
    %78 = tpu.reciprocal %77 {approx = true} : vector<4x16x1xf32> -> vector<4x16x1xf32>
    %79 = vector.broadcast %78 : vector<4x16x1xf32> to vector<4x16x16xf32>
    %80 = arith.mulf %75, %79 : vector<4x16x16xf32>
    %81 = arith.truncf %80 : vector<4x16x16xf32> to vector<4x16x16xbf16>
    "tpu.trace_start"() <{level = 10 : i32, message = "myz,mzv->myv"}> : () -> ()
    %cst_26 = arith.constant dense<0.000000e+00> : vector<4x16x32xf32>
    %82 = tpu.matmul %81, %69, %cst_26 {dimension_numbers = #tpu.dot_dimension_numbers<[2], [1], [1], [2], [0, 0, 0, 1, 1, 2], [0], [0]>} : vector<4x16x16xbf16>, vector<4x16x32xbf16>, vector<4x16x32xf32> -> vector<4x16x32xf32>
    "tpu.trace_stop"() : () -> ()
    %83 = arith.addf %63, %82 : vector<4x16x32xf32>
    %84 = tpu.transpose %62, [1, 0, 2] : vector<16x4x32xf32> -> vector<4x16x32xf32>
    %85 = arith.addf %83, %84 : vector<4x16x32xf32>
    %86 = vector.shape_cast %1 : vector<4x16x32xf32> to vector<64x32xf32>
    %87 = vector.shape_cast %85 : vector<4x16x32xf32> to vector<64x32xf32>
    %88 = arith.addf %86, %87 : vector<64x32xf32>
    %c0_27 = arith.constant 0 : index
    %c0_28 = arith.constant 0 : index
    %89 = vector.load %arg6[%c0_27, %c0_28] : memref<1x32xf32, #tpu.memory_space<vmem>>, vector<1x32xf32>
    %c0_29 = arith.constant 0 : index
    %c0_30 = arith.constant 0 : index
    %90 = vector.load %arg7[%c0_29, %c0_30] : memref<1x32xf32, #tpu.memory_space<vmem>>, vector<1x32xf32>
    %cst_31 = arith.constant dense<0.000000e+00> : vector<64xf32>
    %91 = vector.multi_reduction <add>, %88, %cst_31 [1] : vector<64x32xf32> to vector<64xf32>
    %92 = vector.shape_cast %91 : vector<64xf32> to vector<64x1xf32>
    %cst_32 = arith.constant 3.200000e+01 : f32
    %93 = vector.broadcast %cst_32 : f32 to vector<64x1xf32>
    %94 = arith.divf %92, %93 : vector<64x1xf32>
    %95 = vector.broadcast %94 : vector<64x1xf32> to vector<64x32xf32>
    %96 = arith.subf %88, %95 : vector<64x32xf32>
    %97 = arith.mulf %96, %96 : vector<64x32xf32>
    %cst_33 = arith.constant dense<0.000000e+00> : vector<64xf32>
    %98 = vector.multi_reduction <add>, %97, %cst_33 [1] : vector<64x32xf32> to vector<64xf32>
    %99 = vector.shape_cast %98 : vector<64xf32> to vector<64x1xf32>
    %cst_34 = arith.constant 3.200000e+01 : f32
    %100 = vector.broadcast %cst_34 : f32 to vector<64x1xf32>
    %101 = arith.divf %99, %100 : vector<64x1xf32>
    %102 = vector.broadcast %94 : vector<64x1xf32> to vector<64x32xf32>
    %103 = arith.subf %88, %102 : vector<64x32xf32>
    %cst_35 = arith.constant 9.99999974E-6 : f32
    %104 = vector.broadcast %cst_35 : f32 to vector<64x1xf32>
    %105 = arith.addf %101, %104 : vector<64x1xf32>
    %106 = math.rsqrt %105 : vector<64x1xf32>
    %107 = vector.broadcast %106 : vector<64x1xf32> to vector<64x32xf32>
    %108 = arith.mulf %103, %107 : vector<64x32xf32>
    %109 = vector.broadcast %89 : vector<1x32xf32> to vector<64x32xf32>
    %110 = arith.mulf %108, %109 : vector<64x32xf32>
    %111 = vector.broadcast %90 : vector<1x32xf32> to vector<64x32xf32>
    %112 = arith.addf %110, %111 : vector<64x32xf32>
    %113 = arith.truncf %112 : vector<64x32xf32> to vector<64x32xbf16>
    %c0_36 = arith.constant 0 : index
    %c0_37 = arith.constant 0 : index
    %114 = vector.load %arg8[%c0_36, %c0_37] : memref<32x32xbf16, #tpu.memory_space<vmem>>, vector<32x32xbf16>
    %cst_38 = arith.constant dense<0.000000e+00> : vector<64x32xf32>
    %115 = tpu.matmul %113, %114, %cst_38 {dimension_numbers = #tpu.dot_dimension_numbers<[1], [0], [0], [1], [0, 0, 1, 1], [], []>} : vector<64x32xbf16>, vector<32x32xbf16>, vector<64x32xf32> -> vector<64x32xf32>
    %c0_39 = arith.constant 0 : index
    %c0_40 = arith.constant 0 : index
    %116 = vector.load %arg9[%c0_39, %c0_40] : memref<1x32xf32, #tpu.memory_space<vmem>>, vector<1x32xf32>
    %117 = vector.broadcast %116 : vector<1x32xf32> to vector<64x32xf32>
    %118 = arith.addf %115, %117 : vector<64x32xf32>
    %cst_41 = arith.constant 0.000000e+00 : f32
    %119 = vector.broadcast %cst_41 : f32 to vector<64x32xf32>
    %120 = arith.maximumf %118, %119 : vector<64x32xf32>
    %121 = arith.truncf %120 : vector<64x32xf32> to vector<64x32xbf16>
    %c0_42 = arith.constant 0 : index
    %c0_43 = arith.constant 0 : index
    %122 = vector.load %arg10[%c0_42, %c0_43] : memref<32x32xbf16, #tpu.memory_space<vmem>>, vector<32x32xbf16>
    %cst_44 = arith.constant dense<0.000000e+00> : vector<64x32xf32>
    %123 = tpu.matmul %121, %122, %cst_44 {dimension_numbers = #tpu.dot_dimension_numbers<[1], [0], [0], [1], [0, 0, 1, 1], [], []>} : vector<64x32xbf16>, vector<32x32xbf16>, vector<64x32xf32> -> vector<64x32xf32>
    %c0_45 = arith.constant 0 : index
    %c0_46 = arith.constant 0 : index
    %124 = vector.load %arg11[%c0_45, %c0_46] : memref<1x32xf32, #tpu.memory_space<vmem>>, vector<1x32xf32>
    %125 = vector.broadcast %124 : vector<1x32xf32> to vector<64x32xf32>
    %126 = arith.addf %123, %125 : vector<64x32xf32>
    %127 = arith.addf %88, %126 : vector<64x32xf32>
    %128 = vector.shape_cast %127 : vector<64x32xf32> to vector<4x16x32xf32>
    %c0_47 = arith.constant 0 : index
    %c0_48 = arith.constant 0 : index
    %c0_49 = arith.constant 0 : index
    %c0_50 = arith.constant 0 : index
    %129 = vector.load %arg12[%c0_47, %c0_48, %c0_49, %c0_50] : memref<1x4x16x32xf32, #tpu.memory_space<vmem>>, vector<1x4x16x32xf32>
    %130 = vector.shape_cast %129 : vector<1x4x16x32xf32> to vector<4x16x32xf32>
    %131 = vector.shape_cast %128 : vector<4x16x32xf32> to vector<1x4x16x32xf32>
    tpu.vector_store %arg12[%c0_47, %c0_48, %c0_49, %c0_50], %131 {strides = array<i32>} : memref<1x4x16x32xf32, #tpu.memory_space<vmem>>, vector<1x4x16x32xf32>,
    return
  }
  func.func @transform_0(%arg0: i32) -> (i32, i32, i32, i32) {
    %c0_i32 = arith.constant 0 : i32
    %c0_i32_0 = arith.constant 0 : i32
    %c0_i32_1 = arith.constant 0 : i32
    %c0_i32_2 = arith.constant 0 : i32
    return %arg0, %c0_i32, %c0_i32_0, %c0_i32_1 : i32, i32, i32, i32
  }
  func.func @transform_1(%arg0: i32) -> (i32, i32) {
    %c0_i32 = arith.constant 0 : i32
    %c0_i32_0 = arith.constant 0 : i32
    %c0_i32_1 = arith.constant 0 : i32
    return %c0_i32, %c0_i32_0 : i32, i32
  }
  func.func @transform_2(%arg0: i32) -> (i32, i32) {
    %c0_i32 = arith.constant 0 : i32
    %c0_i32_0 = arith.constant 0 : i32
    %c0_i32_1 = arith.constant 0 : i32
    return %c0_i32, %c0_i32_0 : i32, i32
  }
  func.func @transform_3(%arg0: i32) -> (i32, i32) {
    %c0_i32 = arith.constant 0 : i32
    %c0_i32_0 = arith.constant 0 : i32
    %c0_i32_1 = arith.constant 0 : i32
    return %c0_i32, %c0_i32_0 : i32, i32
  }
  func.func @transform_4(%arg0: i32) -> (i32, i32) {
    %c0_i32 = arith.constant 0 : i32
    %c0_i32_0 = arith.constant 0 : i32
    %c0_i32_1 = arith.constant 0 : i32
    return %c0_i32, %c0_i32_0 : i32, i32
  }
  func.func @transform_5(%arg0: i32) -> (i32, i32) {
    %c0_i32 = arith.constant 0 : i32
    %c0_i32_0 = arith.constant 0 : i32
    %c0_i32_1 = arith.constant 0 : i32
    return %c0_i32, %c0_i32_0 : i32, i32
  }
  func.func @transform_6(%arg0: i32) -> (i32, i32) {
    %c0_i32 = arith.constant 0 : i32
    %c0_i32_0 = arith.constant 0 : i32
    %c0_i32_1 = arith.constant 0 : i32
    return %c0_i32, %c0_i32_0 : i32, i32
  }
  func.func @transform_7(%arg0: i32) -> (i32, i32) {
    %c0_i32 = arith.constant 0 : i32
    %c0_i32_0 = arith.constant 0 : i32
    %c0_i32_1 = arith.constant 0 : i32
    return %c0_i32, %c0_i32_0 : i32, i32
  }
  func.func @transform_8(%arg0: i32) -> (i32, i32) {
    %c0_i32 = arith.constant 0 : i32
    %c0_i32_0 = arith.constant 0 : i32
    %c0_i32_1 = arith.constant 0 : i32
    return %c0_i32, %c0_i32_0 : i32, i32
  }
  func.func @transform_9(%arg0: i32) -> (i32, i32) {
    %c0_i32 = arith.constant 0 : i32
    %c0_i32_0 = arith.constant 0 : i32
    %c0_i32_1 = arith.constant 0 : i32
    return %c0_i32, %c0_i32_0 : i32, i32
  }
  func.func @transform_10(%arg0: i32) -> (i32, i32) {
    %c0_i32 = arith.constant 0 : i32
    %c0_i32_0 = arith.constant 0 : i32
    %c0_i32_1 = arith.constant 0 : i32
    return %c0_i32, %c0_i32_0 : i32, i32
  }
  func.func @transform_11(%arg0: i32) -> (i32, i32, i32, i32) {
    %c0_i32 = arith.constant 0 : i32
    %c0_i32_0 = arith.constant 0 : i32
    %c0_i32_1 = arith.constant 0 : i32
    %c0_i32_2 = arith.constant 0 : i32
    return %arg0, %c0_i32, %c0_i32_0, %c0_i32_1 : i32, i32, i32, i32
  }
}

</mosaic_0001>

<bundles_post_ra>
// kernel: maa_block_forward.1
= control target key start
LH: loop header
LB: loop body
LE: loop exit
PB: predicated region body
PF: predicated region fallthrough
CT: control target
= control target key end

     0   :  { %s3107_s17 = smov 0   ;;  %s4077_s0 = inlined_call_operand.vmem [shape: f32[2,4,16,32], index: 0, kind: input, shape index: {}]   ;;  %s4078_s1 = inlined_call_operand.vmem [shape: f32[1,32], index: 1, kind: input, shape index: {}]   ;;  %s4079_s2 = inlined_call_operand.vmem [shape: f32[1,32], index: 2, kind: input, shape index: {}]   ;;  %s4080_s3 = inlined_call_operand.vmem [shape: bf16[32,96], index: 3, kind: input, shape index: {}]   ;;  %s4081_s4 = inlined_call_operand.vmem [shape: bf16[32,96], index: 4, kind: input, shape index: {}]   ;;  %s4082_s5 = inlined_call_operand.vmem [shape: f32[1,32], index: 5, kind: input, shape index: {}]   ;;  %s4083_s6 = inlined_call_operand.vmem [shape: f32[1,32], index: 6, kind: input, shape index: {}]   ;;  %s4084_s7 = inlined_call_operand.vmem [shape: bf16[32,32], index: 7, kind: input, shape index: {}]   ;;  %s4085_s8 = inlined_call_operand.vmem [shape: f32[1,32], index: 8, kind: input, shape index: {}]   ;;  %s4086_s9 = inlined_call_operand.vmem [shape: bf16[32,32], index: 9, kind: input, shape index: {}]   ;;  %s4087_s10 = inlined_call_operand.vmem [shape: f32[1,32], index: 10, kind: input, shape index: {}]   ;;  %s4088_s11 = inlined_call_operand.vmem [shape: f32[2,4,16,32], index: 11, kind: output, shape index: {}]  }
   0x1 LB: > { %s2764_s18 = sadd.s32 4294967295, %s3040_s17   ;;  %p2768_p0 = scmp.ge.s32.totalorder %s3040_s17, 1  ;;  %s3040_s17 = sphi %s3107_s17, %s21_s17  }
   0x2   : > { %p337_p1 = scmp.lt.s32.totalorder %s3040_s17, 3 }
   0x4   : > { %p338_p2 = pnand %p2768_p0, %p337_p1 }
   0x5   : > { %p377_p3 = scmp.lt.s32.totalorder (!%p338_p2), %s2764_s18, 1  ;;  %s3045_s16 = smov (!%p338_p2), 96  }
   0x6   : > { %341 = sbr.rel (%p338_p2) target bundleno = 2345 (0x929), region = 64  ;;  %s3046_s20 = smov (!%p338_p2), 64  }
   0xb   : > { %s4092_s18 = smov (!%p377_p3, %s2764_s18), 1  ;;  %vm398_vm0 = vcmask 261120   ;;  %v3042_v8 = vmov 32.0   ;;  %vm609_vm13 = vcmask 1047556  }
   0xc   : > { %s2863_s19 = sshll.u32 %s4092_s18, 6  ;;  %2896 = vrcp.f32 %v3042_v8 }
   0xd   : > { %s3123_s22 = scalar_lea.vmem %s4077_s0, %s2863_s19  ;;  %s386_s23 = scalar_lea.vmem %s4088_s11, %s2863_s19 }
   0xe   : > { %v392_v0 = vld [vmem:[%s3123_s22 + $0x20] sm:$0xff]  ;;  %v394_v4 = vld [vmem:[%s3123_s22 + $0x30] sm:$0xff]  ;;  %v395_v29 = vld [vmem:[%s3123_s22 + $0x38] sm:$0xff] }
   0xf   : > { %v388_v1 = vld [vmem:[%s3123_s22] sm:$0xff]  ;;  %v411_v2 = vsel %vm398_vm0, %v392_v0, 0.0  ;;  %v390_v5 = vld [vmem:[%s3123_s22 + $0x10] sm:$0xff]  ;;  %v417_v6 = vsel %vm398_vm0, %v394_v4, 0.0  ;;  %v420_v33 = vsel %vm398_vm0, %v395_v29, 0.0  ;;  %v393_v37 = vld [vmem:[%s3123_s22 + $0x28] sm:$0xff] }
  0x10   : > { %v399_v3 = vsel %vm398_vm0, %v388_v1, 0.0  ;;  %412 = vadd.xlane.f32.xlu0 %v411_v2  ;;  %v405_v7 = vsel %vm398_vm0, %v390_v5, 0.0  ;;  %v389_v38 = vld [vmem:[%s3123_s22 + $0x8] sm:$0xff]  ;;  %v414_v39 = vsel %vm398_vm0, %v393_v37, 0.0  ;;  %v3166_v41 = vld [vmem:[%s3123_s22 + $0x18] sm:$0xff] }
  0x11   : > { %400 = vadd.xlane.f32.xlu1 %v399_v3  ;;  %v402_v40 = vsel %vm398_vm0, %v389_v38, 0.0  ;;  %v408_v42 = vsel %vm398_vm0, %v3166_v41, 0.0 }
  0x12   : > { %v2897_v9 = vpop.eup %2896 }
  0x13   : > { %v424_v10 = vmul.f32 32.0, %v2897_v9  ;;  %vm428_vm1 = vweird.f32 %v2897_v9 }
  0x15   : > { %v425_v11 = vsub.f32 1.0, %v424_v10 }
  0x17   : > { %v426_v12 = vmul.f32 %v2897_v9, %v425_v11 }
  0x18   : > { %418 = vadd.xlane.f32.xlu0 %v417_v6 }
  0x19   : > { %406 = vadd.xlane.f32.xlu1 %v405_v7  ;;  %v427_v13 = vadd.f32 %v2897_v9, %v426_v12 }
  0x1b   : > { %v3133_v14 = vsel %vm428_vm1, %v2897_v9, %v427_v13 }
  0x83   : > { %v413_v15 = vpop.xlane.xlu0 %412 }
  0x84   : > { %v401_v16 = vpop.xlane.xlu1 %400  ;;  %v434_v17 = vmul.f32 %v3133_v14, %v413_v15 }
  0x85   : > { %v430_v18 = vmul.f32 %v3133_v14, %v401_v16 }
  0x86   : > { %v3137_v19 = vsub.f32 %v392_v0, %v434_v17  ;;  %v3196_v17 = vld [vmem:[%s4078_s1] ss:$0 sm:$0xff] }
  0x87   : > { %v3139_v20 = vsub.f32 %v388_v1, %v430_v18 }
  0x88   : > { %v450_v21 = vmul.f32 %v3137_v19, %v3137_v19 }
  0x89   : > { %v446_v22 = vmul.f32 %v3139_v20, %v3139_v20 }
  0x8a   : > { %v466_v23 = vsel %vm398_vm0, %v450_v21, 0.0 }
  0x8b   : > { %v454_v24 = vsel %vm398_vm0, %v446_v22, 0.0  ;;  %467 = vadd.xlane.f32.xlu2 %v466_v23  ;;  %v419_v25 = vpop.xlane.xlu0 %418 }
  0x8c   : > { %455 = vadd.xlane.f32.xlu0 %v454_v24  ;;  %v407_v26 = vpop.xlane.xlu1 %406  ;;  %v436_v27 = vmul.f32 %v3133_v14, %v419_v25 }
  0x8d   : > { %v432_v28 = vmul.f32 %v3133_v14, %v407_v26  ;;  %v3206_v26 = vld [vmem:[%s4079_s2] ss:$0 sm:$0xff] }
  0x8e   : > { %v3150_v30 = vsub.f32 %v394_v4, %v436_v27 }
  0x8f   : > { %v3152_v31 = vsub.f32 %v390_v5, %v432_v28 }
  0x90   : > { %v452_v32 = vmul.f32 %v3150_v30, %v3150_v30 }
  0x91   : > { %v448_v34 = vmul.f32 %v3152_v31, %v3152_v31 }
  0x92   : > { %v472_v35 = vsel %vm398_vm0, %v452_v32, 0.0 }
  0x93   : > { %v460_v36 = vsel %vm398_vm0, %v448_v34, 0.0  ;;  %473 = vadd.xlane.f32.xlu2 %v472_v35 }
  0x94   : > { %421 = vadd.xlane.f32.xlu0 %v420_v33  ;;  %461 = vadd.xlane.f32.xlu1 %v460_v36  ;;  %v2868_v33 = vld [vmem:[%s4080_s3 + $0x8] sm:$0xff] }
  0x95   : > { %871 = vmatpush.bf16.msra.mxu1 %v2868_v33  ;;  %2875 = vmatpush.bf16.msra.mxu3 %v2868_v33 }
  0x9b   : > { %415 = vadd.xlane.f32.xlu2 %v414_v39 }
  0x9c   : > { %403 = vadd.xlane.f32.xlu1 %v402_v40  ;;  %v2867_v40 = vld [vmem:[%s4080_s3] sm:$0xff] }
  0x9d   : > { %872 = vmatpush.bf16.msra.mxu1 %v2867_v40  ;;  %2876 = vmatpush.bf16.msra.mxu3 %v2867_v40 }
  0xa3   : > { %409 = vadd.xlane.f32.xlu2 %v408_v42 }
  0xfe   : > { %v468_v43 = vpop.xlane.xlu2 %467 }
  0xff   : > { %v456_v44 = vpop.xlane.xlu0 %455  ;;  %v482_v45 = vmul.f32 %v468_v43, %v3133_v14 }
 0x100   : > { %v478_v46 = vmul.f32 %v456_v44, %v3133_v14 }
 0x101   : > { %v490_v47 = vadd.f32 1e-05, %v482_v45 }
 0x102   : > { %v486_v48 = vadd.f32 1e-05, %v478_v46  ;;  %v3043_v46 = vmov 1983009808  }
 0x103   : > { %2898 = vrsqrt.f32 %v490_v47  ;;  %vm540_vm5 = vweird.f32 %v490_v47 }
 0x104   : > { %2900 = vrsqrt.f32 %v486_v48  ;;  %vm500_vm3 = vweird.f32 %v486_v48 }
 0x106   : > { %v474_v49 = vpop.xlane.xlu2 %473 }
 0x107   : > { %v422_v50 = vpop.xlane.xlu0 %421  ;;  %v484_v51 = vmul.f32 %v474_v49, %v3133_v14  ;;  %v462_v53 = vpop.xlane.xlu1 %461 }
 0x108   : > { %v437_v52 = vmul.f32 %v3133_v14, %v422_v50  ;;  %v480_v54 = vmul.f32 %v462_v53, %v3133_v14 }
 0x109   : > { %v2899_v55 = vpop.eup %2898  ;;  %v3175_v56 = vadd.f32 1e-05, %v484_v51 }
 0x10a   : > { %v3177_v57 = vsub.f32 %v395_v29, %v437_v52  ;;  %v2901_v58 = vpop.eup %2900  ;;  %v535_v59 = vmul.f32 %v2899_v55, %v490_v47  ;;  %v3179_v60 = vadd.f32 1e-05, %v480_v54  ;;  %vm541_vm2 = vweird.f32 %v2899_v55 }
 0x10b   : > { %v495_v61 = vmul.f32 %v2901_v58, %v486_v48  ;;  %2902 = vrsqrt.f32 %v3175_v56  ;;  %vm501_vm4 = vweird.f32 %v2901_v58  ;;  %vm542_vm6 = vmor %vm540_vm5, %vm541_vm2  ;;  %v614_v47 = vunpack.c.l.s4 %v3043_v46 }
 0x10c   : > { %v536_v62 = vmul.f32 %v2899_v55, %v535_v59  ;;  %2904 = vrsqrt.f32 %v3179_v60  ;;  %v453_v63 = vmul.f32 %v3177_v57, %v3177_v57  ;;  %vm502_vm7 = vmor %vm500_vm3, %vm501_vm4  ;;  %vm520_vm9 = vweird.f32 %v3179_v60 }
 0x10d   : > { %v496_v0 = vmul.f32 %v2901_v58, %v495_v61  ;;  %vm560_vm11 = vweird.f32 %v3175_v56 }
 0x10e   : > { %v537_v1 = vmul.f32 0.5, %v536_v62  ;;  %v416_v2 = vpop.xlane.xlu2 %415  ;;  %v475_v3 = vsel %vm398_vm0, %v453_v63, 0.0 }
 0x10f   : > { %v497_v4 = vmul.f32 0.5, %v496_v0  ;;  %v435_v5 = vmul.f32 %v3133_v14, %v416_v2  ;;  %476 = vadd.xlane.f32.xlu1 %v475_v3  ;;  %v404_v6 = vpop.xlane.xlu1 %403  ;;  %v3044_v0 = vmov 1934713408  }
 0x110   : > { %v538_v7 = vsub.f32 1.5, %v537_v1  ;;  %v431_v8 = vmul.f32 %v3133_v14, %v404_v6  ;;  %v638_v1 = vunpack.c.l.s4 %v3044_v0 }
 0x111   : > { %v2903_v9 = vpop.eup %2902  ;;  %v498_v10 = vsub.f32 1.5, %v497_v4  ;;  %v3188_v11 = vsub.f32 %v393_v37, %v435_v5 }
 0x112   : > { %v2905_v12 = vpop.eup %2904  ;;  %v539_v13 = vmul.f32 %v2899_v55, %v538_v7  ;;  %v555_v15 = vmul.f32 %v2903_v9, %v3175_v56  ;;  %v3191_v16 = vsub.f32 %v389_v38, %v431_v8  ;;  %vm561_vm8 = vweird.f32 %v2903_v9 }
 0x113   : > { %v499_v18 = vmul.f32 %v2901_v58, %v498_v10  ;;  %v515_v21 = vmul.f32 %v2905_v12, %v3179_v60  ;;  %v451_v22 = vmul.f32 %v3188_v11, %v3188_v11  ;;  %vm521_vm10 = vweird.f32 %v2905_v12  ;;  %vm562_vm12 = vmor %vm560_vm11, %vm561_vm8 }
 0x114   : > { %v543_v23 = vsel %vm542_vm6, %v2899_v55, %v539_v13  ;;  %v556_v24 = vmul.f32 %v2903_v9, %v555_v15  ;;  %v447_v25 = vmul.f32 %v3191_v16, %v3191_v16  ;;  %vm522_vm14 = vmor %vm520_vm9, %vm521_vm10  ;;  %v3260_v6 = vunpack.c.0.s8 %v638_v1 }
 0x115   : > { %v578_v27 = vmul.f32 %v543_v23, %v3137_v19  ;;  %v503_v28 = vsel %vm502_vm7, %v2901_v58, %v499_v18  ;;  %v516_v29 = vmul.f32 %v2905_v12, %v515_v21  ;;  %v469_v32 = vsel %vm398_vm0, %v451_v22, 0.0 }
 0x116   : > { %v574_v34 = vmul.f32 %v503_v28, %v3139_v20  ;;  %v557_v35 = vmul.f32 0.5, %v556_v24  ;;  %v410_v36 = vpop.xlane.xlu2 %409  ;;  %470 = vadd.xlane.f32.xlu0 %v469_v32  ;;  %v457_v37 = vsel %vm398_vm0, %v447_v25, 0.0  ;;  %v3241_v58 = vunpack.c.0.s8 %v614_v47 }
 0x117   : > { %v589_v38 = vmul.f32 %v3196_v17, %v578_v27  ;;  %v517_v39 = vmul.f32 0.5, %v516_v29  ;;  %v433_v19 = vmul.f32 %v3133_v14, %v410_v36  ;;  %458 = vadd.xlane.f32.xlu2 %v457_v37 }
 0x118   : > { %v585_v42 = vmul.f32 %v3196_v17, %v574_v34  ;;  %v558_v43 = vsub.f32 1.5, %v557_v35 }
 0x119   : > { %v3223_v20 = vadd.f32 %v3206_v26, %v589_v38  ;;  %v518_v44 = vsub.f32 1.5, %v517_v39  ;;  %v3226_v45 = vsub.f32 %v3166_v41, %v433_v19 }
 0x11a   : > { %v3229_v48 = vadd.f32 %v3206_v26, %v585_v42  ;;  %v559_v49 = vmul.f32 %v2903_v9, %v558_v43 }
 0x11b   : > { %v608_v50 = vrot.slane %v3223_v20, 4  ;;  %v519_v51 = vmul.f32 %v2905_v12, %v518_v44  ;;  %v449_v52 = vmul.f32 %v3226_v45, %v3226_v45 }
 0x11c   : > { %v611_v41 = vrot.slane %v3229_v48, 4  ;;  %v563_v53 = vsel %vm562_vm12, %v2903_v9, %v559_v49  ;;  %vm930_vm12 = vcmask 1043458  }
 0x11d   : > { %v580_v54 = vmul.f32 %v563_v53, %v3150_v30  ;;  %v523_v55 = vsel %vm522_vm14, %v2905_v12, %v519_v51  ;;  %v463_v56 = vsel %vm398_vm0, %v449_v52, 0.0  ;;  %v610_v61 = vsel %vm609_vm13, %v608_v50, %v3229_v48  ;;  %v2866_v50 = vld [vmem:[%s4081_s4 + $0x8] sm:$0xff]  ;;  %v2865_v52 = vld [vmem:[%s4081_s4] sm:$0xff] }
 0x11e   : > { %v576_v59 = vmul.f32 %v523_v55, %v3152_v31  ;;  %464 = vadd.xlane.f32.xlu0 %v463_v56  ;;  %v612_v60 = vsel %vm609_vm13, %v3223_v20, %v611_v41  ;;  %v616_v2 = vperm.slane %v610_v61, %v3241_v58  ;;  %814 = vmatpush.bf16.msra.mxu0 %v2866_v50  ;;  %vm926_vm14 = vcmask 1041408  }
 0x11f   : > { %v591_v62 = vmul.f32 %v3196_v17, %v580_v54  ;;  %v620_v3 = vperm.slane %v612_v60, %v3241_v58  ;;  %2873 = vmatpush.bf16.msra.mxu2 %v2866_v50 }
 0x120   : > { %v587_v63 = vmul.f32 %v3196_v17, %v576_v59  ;;  %v635_v8 = vrot.slane %v616_v2, 4 }
 0x121   : > { %v3251_v30 = vadd.f32 %v3206_v26, %v591_v62  ;;  %v647_v12 = vrot.slane %v620_v3, 4 }
 0x122   : > { %v3255_v31 = vadd.f32 %v3206_v26, %v587_v63  ;;  %815 = vmatpush.bf16.msra.mxu0 %v2865_v52 }
 0x123   : > { %v621_v4 = vrot.slane %v3251_v30, 4  ;;  %2874 = vmatpush.bf16.msra.mxu2 %v2865_v52 }
 0x124   : > { %v623_v5 = vrot.slane %v3255_v31, 4 }
 0x125   : > { %v622_v7 = vsel %vm609_vm13, %v621_v4, %v3255_v31 }
 0x126   : > { %v624_v9 = vsel %vm609_vm13, %v3251_v30, %v623_v5  ;;  %v628_v10 = vperm.slane %v622_v7, %v3241_v58 }
 0x127   : > { %v632_v13 = vperm.slane %v624_v9, %v3241_v58 }
 0x128   : > { %v633_v15 = vrot.slane %v628_v10, 4  ;;  %v636_v18 = vsel %vm609_vm13, %v628_v10, %v635_v8 }
 0x129   : > { %v644_v21 = vperm.slane %v636_v18, %v3260_v6  ;;  %v645_v22 = vrot.slane %v632_v13, 4  ;;  %v648_v23 = vsel %vm609_vm13, %v632_v13, %v647_v12 }
 0x12a   : > { %v634_v24 = vsel %vm609_vm13, %v633_v15, %v616_v2  ;;  %v656_v25 = vperm.slane %v648_v23, %v3260_v6 }
 0x12b   : > { %v640_v27 = vperm.slane %v634_v24, %v3260_v6  ;;  %v646_v28 = vsel %vm609_vm13, %v645_v22, %v620_v3  ;;  %v659_v29 = vrot.slane %v644_v21, 4  ;;  %741 = vst [vmem:[#allocation1 + $0x10] ss:$2 sm:$0xff] %v644_v21 }
 0x12c   : > { %v652_v32 = vperm.slane %v646_v28, %v3260_v6  ;;  %v663_v33 = vrot.slane %v656_v25, 4  ;;  %749 = vst [vmem:[#allocation1 + $0x30] ss:$2 sm:$0xff] %v656_v25 }
 0x12d   : > { %v657_v34 = vrot.slane %v640_v27, 4  ;;  %v660_v35 = vsel %vm609_vm13, 0.0, %v659_v29  ;;  %737 = vst [vmem:[#allocation1] ss:$2 sm:$0xff] %v640_v27 }
 0x12e   : > { %v661_v36 = vrot.slane %v652_v32, 4  ;;  %743 = vst [vmem:[#allocation1 + $0x11] ss:$2 sm:$0xff] %v660_v35  ;;  %v664_v38 = vsel %vm609_vm13, 0.0, %v663_v33 }
 0x12f   : > { %v658_v37 = vsel %vm609_vm13, 0.0, %v657_v34  ;;  %745 = vst [vmem:[#allocation1 + $0x20] ss:$2 sm:$0xff] %v652_v32 }
 0x130   : > { %v662_v39 = vsel %vm609_vm13, 0.0, %v661_v36  ;;  %739 = vst [vmem:[#allocation1 + $0x1] ss:$2 sm:$0xff] %v658_v37 }
 0x131   : > { %747 = vst [vmem:[#allocation1 + $0x21] ss:$2 sm:$0xff] %v662_v39 }
 0x132   : > { %751 = vst [vmem:[#allocation1 + $0x31] ss:$2 sm:$0xff] %v664_v38 }
 0x135   : > { %v753_v40 = vld.sshfl [vmem:[#allocation1 + $0x10] sm:$0xff pattern:$0x75316420] }
 0x137   : > { %v752_v19 = vld.sshfl [vmem:[#allocation1] sm:$0xff pattern:$0x75316420] }
 0x138   : > { %v776_v42 = vpack.c.bf16 %v753_v40, %v752_v19  ;;  %v754_v43 = vld.sshfl [vmem:[#allocation1 + $0x20] sm:$0xff pattern:$0x75316420] }
 0x139   : > { %v755_v44 = vld.sshfl [vmem:[#allocation1 + $0x30] sm:$0xff pattern:$0x75316420] }
 0x13a   : > { %2793 = vmatmul.msk.bf16.vlgmr.msra.gmra.mxu1 %vm398_vm0, %v776_v42  ;;  %v777_v46 = vpack.c.bf16 %v755_v44, %v754_v43 }
 0x14a   : > { %2794 = vmatmul.msk.bf16.gmra.mxu1 %vm398_vm0, %v777_v46 }
 0x182   : > { %v477_v47 = vpop.xlane.xlu1 %476 }
 0x183   : > { %v485_v49 = vmul.f32 %v477_v47, %v3133_v14 }
 0x185   : > { %v493_v51 = vadd.f32 1e-05, %v485_v49 }
 0x187   : > { %2906 = vrsqrt.f32 %v493_v51  ;;  %vm570_vm15 = vweird.f32 %v493_v51 }
 0x189   : > { %v471_v41 = vpop.xlane.xlu0 %470 }
 0x18a   : > { %v483_v53 = vmul.f32 %v471_v41, %v3133_v14  ;;  %v459_v54 = vpop.xlane.xlu2 %458 }
 0x18b   : > { %v479_v55 = vmul.f32 %v459_v54, %v3133_v14 }
 0x18c   : > { %v491_v56 = vadd.f32 1e-05, %v483_v53 }
 0x18d   : > { %v2907_v59 = vpop.eup %2906  ;;  %v487_v61 = vadd.f32 1e-05, %v479_v55 }
 0x18e   : > { %v565_v62 = vmul.f32 %v2907_v59, %v493_v51  ;;  %2908 = vrsqrt.f32 %v491_v56  ;;  %vm571_vm1 = vweird.f32 %v2907_v59  ;;  %vm550_vm6 = vweird.f32 %v491_v56 }
 0x18f   : > { %2910 = vrsqrt.f32 %v487_v61  ;;  %vm3292_vm2 = vmor %vm570_vm15, %vm571_vm1  ;;  %vm510_vm4 = vweird.f32 %v487_v61  ;;  %vm1352_vm15 = vcmask 27648   ;;  %vm1550_vm1 = vcmask 31744  }
 0x190   : > { %v566_v60 = vmul.f32 %v2907_v59, %v565_v62 }
 0x191   : > { %v465_v63 = vpop.xlane.xlu0 %464 }
 0x192   : > { %v567_v0 = vmul.f32 0.5, %v566_v60  ;;  %v481_v1 = vmul.f32 %v465_v63, %v3133_v14 }
 0x194   : > { %v2909_v2 = vpop.eup %2908  ;;  %v489_v3 = vadd.f32 1e-05, %v481_v1  ;;  %v568_v5 = vsub.f32 1.5, %v567_v0 }
 0x195   : > { %v2911_v4 = vpop.eup %2910  ;;  %v545_v7 = vmul.f32 %v2909_v2, %v491_v56  ;;  %vm551_vm3 = vweird.f32 %v2909_v2 }
 0x196   : > { %v505_v8 = vmul.f32 %v2911_v4, %v487_v61  ;;  %2912 = vrsqrt.f32 %v489_v3  ;;  %v569_v12 = vmul.f32 %v2907_v59, %v568_v5  ;;  %vm511_vm5 = vweird.f32 %v2911_v4  ;;  %vm552_vm7 = vmor %vm550_vm6, %vm551_vm3 }
 0x197   : > { %v546_v9 = vmul.f32 %v2909_v2, %v545_v7  ;;  %vm512_vm8 = vmor %vm510_vm4, %vm511_vm5  ;;  %vm530_vm10 = vweird.f32 %v489_v3 }
 0x198   : > { %v506_v10 = vmul.f32 %v2911_v4, %v505_v8  ;;  %v573_v24 = vsel %vm3292_vm2, %v2907_v59, %v569_v12  ;;  %vm2038_vm2 = vcmask 130048  }
 0x199   : > { %v547_v13 = vmul.f32 0.5, %v546_v9  ;;  %v581_v33 = vmul.f32 %v573_v24, %v3177_v57 }
 0x19a   : > { %v507_v18 = vmul.f32 0.5, %v506_v10 }
 0x19b   : > { %v548_v21 = vsub.f32 1.5, %v547_v13  ;;  %v592_v42 = vmul.f32 %v3196_v17, %v581_v33 }
 0x19c   : > { %v2913_v22 = vpop.eup %2912  ;;  %v508_v23 = vsub.f32 1.5, %v507_v18 }
 0x19d   : > { %v549_v25 = vmul.f32 %v2909_v2, %v548_v21  ;;  %v525_v27 = vmul.f32 %v2913_v22, %v489_v3  ;;  %vm531_vm9 = vweird.f32 %v2913_v22  ;;  %v603_v51 = vadd.f32 %v3206_v26, %v592_v42 }
 0x19e   : > { %v509_v28 = vmul.f32 %v2911_v4, %v508_v23  ;;  %vm532_vm11 = vmor %vm530_vm10, %vm531_vm9 }
 0x19f   : > { %v553_v29 = vsel %vm552_vm7, %v2909_v2, %v549_v25  ;;  %v526_v32 = vmul.f32 %v2913_v22, %v525_v27  ;;  %v607_v7 = vpack.c.bf16 %v603_v51, %v3251_v30 }
 0x1a0   : > { %v579_v34 = vmul.f32 %v553_v29, %v3188_v11  ;;  %v513_v35 = vsel %vm512_vm8, %v2911_v4, %v509_v28 }
 0x1a1   : > { %v575_v36 = vmul.f32 %v513_v35, %v3191_v16  ;;  %v527_v37 = vmul.f32 0.5, %v526_v32 }
 0x1a2   : > { %v590_v38 = vmul.f32 %v3196_v17, %v579_v34 }
 0x1a3   : > { %v528_v39 = vsub.f32 1.5, %v527_v37  ;;  %v586_v19 = vmul.f32 %v3196_v17, %v575_v36 }
 0x1a4   : > { %v601_v40 = vadd.f32 %v3206_v26, %v590_v38 }
 0x1a5   : > { %v529_v43 = vmul.f32 %v2913_v22, %v528_v39  ;;  %v597_v57 = vadd.f32 %v3206_v26, %v586_v19 }
 0x1a6   : > { %v606_v11 = vpack.c.bf16 %v601_v40, %v3223_v20  ;;  %v665_v44 = vrot.slane %v601_v40, 4 }
 0x1a7   : > { %v533_v16 = vsel %vm532_vm11, %v2913_v22, %v529_v43  ;;  %v604_v46 = vpack.c.bf16 %v597_v57, %v3229_v48  ;;  %v667_v47 = vrot.slane %v597_v57, 4  ;;  %v677_v48 = vrot.slane %v603_v51, 4 }
 0x1a8   : > { %v577_v49 = vmul.f32 %v533_v16, %v3226_v45  ;;  %v666_v50 = vsel %vm609_vm13, %v665_v44, %v597_v57  ;;  %2783 = vmatmul.msk.bf16.vlgmr.msra.gmra.mxu2 %vm398_vm0, %v606_v11 }
 0x1a9   : > { %2781 = vmatmul.msk.bf16.vlgmr.msra.gmra.mxu0 %vm398_vm0, %v604_v46  ;;  %v668_v52 = vsel %vm609_vm13, %v601_v40, %v667_v47  ;;  %v672_v20 = vperm.slane %v666_v50, %v3241_v58 }
 0x1aa   : > { %v588_v41 = vmul.f32 %v3196_v17, %v577_v49  ;;  %v676_v54 = vperm.slane %v668_v52, %v3241_v58 }
 0x1ab   : > { %v691_v56 = vrot.slane %v672_v20, 4 }
 0x1ac   : > { %v599_v53 = vadd.f32 %v3206_v26, %v588_v41  ;;  %v703_v62 = vrot.slane %v676_v54, 4 }
 0x1ae   : > { %v679_v45 = vrot.slane %v599_v53, 4  ;;  %v678_v55 = vsel %vm609_vm13, %v677_v48, %v599_v53  ;;  %v605_v18 = vpack.c.bf16 %v599_v53, %v3255_v31 }
 0x1af   : > { %v684_v59 = vperm.slane %v678_v55, %v3241_v58 }
 0x1b0   : > { %v680_v61 = vsel %vm609_vm13, %v603_v51, %v679_v45 }
 0x1b1   : > { %v688_v60 = vperm.slane %v680_v61, %v3241_v58  ;;  %v689_v63 = vrot.slane %v684_v59, 4  ;;  %v692_v17 = vsel %vm609_vm13, %v684_v59, %v691_v56 }
 0x1b2   : > { %v700_v0 = vperm.slane %v692_v17, %v3260_v6 }
 0x1b3   : > { %v690_v26 = vsel %vm609_vm13, %v689_v63, %v672_v20  ;;  %v701_v1 = vrot.slane %v688_v60, 4  ;;  %v704_v2 = vsel %vm609_vm13, %v688_v60, %v703_v62 }
 0x1b4   : > { %v696_v3 = vperm.slane %v690_v26, %v3260_v6  ;;  %v712_v4 = vperm.slane %v704_v2, %v3260_v6  ;;  %v715_v5 = vrot.slane %v700_v0, 4  ;;  %758 = vst [vmem:[#allocation1 + $0x10] ss:$2 sm:$0xff] %v700_v0 }
 0x1b5   : > { %v702_v8 = vsel %vm609_vm13, %v701_v1, %v676_v54 }
 0x1b6   : > { %v708_v9 = vperm.slane %v702_v8, %v3260_v6  ;;  %v713_v10 = vrot.slane %v696_v3, 4  ;;  %v716_v12 = vsel %vm609_vm13, 0.0, %v715_v5  ;;  %v719_v13 = vrot.slane %v712_v4, 4  ;;  %756 = vst [vmem:[#allocation1] ss:$2 sm:$0xff] %v696_v3 }
 0x1b7   : > { %v874_v15 = vpop.f32.mrf.mxu1  ;;  %759 = vst [vmem:[#allocation1 + $0x11] ss:$2 sm:$0xff] %v716_v12 }
 0x1b8   : > { %v902_v21 = vpack.c.bf16 %v874_v15, %v874_v15  ;;  %v714_v22 = vsel %vm609_vm13, 0.0, %v713_v10  ;;  %v717_v23 = vrot.slane %v708_v9, 4  ;;  %760 = vst [vmem:[#allocation1 + $0x20] ss:$2 sm:$0xff] %v708_v9  ;;  %2784 = vmatmul.msk.bf16.gmra.mxu2 %vm398_vm0, %v607_v7  ;;  %v720_v30 = vsel %vm609_vm13, 0.0, %v719_v13 }
 0x1b9   : > { %2782 = vmatmul.msk.bf16.gmra.mxu0 %vm398_vm0, %v605_v18  ;;  %757 = vst [vmem:[#allocation1 + $0x1] ss:$2 sm:$0xff] %v714_v22 }
 0x1ba   : > { %v918_v24 = vrot.slane %v902_v21, 2  ;;  %v718_v25 = vsel %vm609_vm13, 0.0, %v717_v23  ;;  %762 = vst [vmem:[#allocation1 + $0x30] ss:$2 sm:$0xff] %v712_v4 }
 0x1bb   : > { %761 = vst [vmem:[#allocation1 + $0x21] ss:$2 sm:$0xff] %v718_v25 }
 0x1bc   : > { %v931_v31 = vsel %vm930_vm12, %v902_v21, %v918_v24  ;;  %763 = vst [vmem:[#allocation1 + $0x31] ss:$2 sm:$0xff] %v720_v30  ;;  %v3340_v27 = vsel %vm926_vm14, %v902_v21, %v918_v24 }
 0x1bd   : > { %v984_v28 = vsel %vm398_vm0, %v3340_v27, 0  ;;  %v3344_v29 = vrot.slane %v931_v31, 2 }
 0x1be   : > { %993 = vmatpush.bf16.xpose.msrb.mxu2 %v984_v28  ;;  %v765_v35 = vld.sshfl [vmem:[#allocation1 + $0x10] sm:$0xff pattern:$0x75316420] }
 0x1bf   : > { %v876_v32 = vpop.f32.mrf.mxu1  ;;  %v1008_v33 = vsel %vm398_vm0, %v3344_v29, 0 }
 0x1c0   : > { %v764_v34 = vld.sshfl [vmem:[#allocation1] sm:$0xff pattern:$0x75316420]  ;;  %v903_v36 = vpack.c.bf16 %v876_v32, %v876_v32  ;;  %1017 = vmatpush.bf16.xpose.msrb.mxu3 %v1008_v33 }
 0x1c1   : > { %976 = vst [vmem:[#allocation1] ss:$4 sm:$0xff] %v3340_v27  ;;  %v778_v37 = vpack.c.bf16 %v765_v35, %v764_v34 }
 0x1c2   : > { %v919_v38 = vrot.slane %v903_v36, 2  ;;  %v766_v11 = vld.sshfl [vmem:[#allocation1 + $0x20] sm:$0xff pattern:$0x75316420] }
 0x1c3   : > { %2795 = vmatmul.msk.bf16.vlgmr.msra.gmra.mxu3 %vm398_vm0, %v778_v37  ;;  %v767_v16 = vld.sshfl [vmem:[#allocation1 + $0x30] sm:$0xff pattern:$0x75316420] }
 0x1c4   : > { %v937_v39 = vsel %vm930_vm12, %v903_v36, %v919_v38  ;;  %v3352_v19 = vsel %vm926_vm14, %v903_v36, %v919_v38  ;;  %v779_v46 = vpack.c.bf16 %v767_v16, %v766_v11 }
 0x1c5   : > { %v3354_v40 = vrot.slane %v937_v39, 2  ;;  %v1031_v42 = vsel %vm398_vm0, %v3352_v19, 0 }
 0x1c6   : > { %1040 = vmatpush.bf16.xpose.msra.mxu2 %v1031_v42 }
 0x1c7   : > { %v1055_v43 = vsel %vm398_vm0, %v3354_v40, 0  ;;  %v879_v47 = vpop.f32.mrf.mxu1 }
 0x1c8   : > { %v977_v57 = vld.sshfl [vmem:[#allocation1] sm:$0xff pattern:$0x73625140]  ;;  %1064 = vmatpush.bf16.xpose.msra.mxu3 %v1055_v43  ;;  %v904_v50 = vpack.c.bf16 %v879_v47, %v879_v47 }
 0x1c9   : > { %1000 = vst [vmem:[#allocation1] ss:$4 sm:$0xff] %v3344_v29  ;;  %979 = vrot.lane.b32.xlu1 %v977_v57, %s3045_s16 }
 0x1ca   : > { %v920_v51 = vrot.slane %v904_v50, 2 }
 0x1cc   : > { %v3368_v41 = vsel %vm926_vm14, %v904_v50, %v920_v51  ;;  %v943_v20 = vsel %vm930_vm12, %v904_v50, %v920_v51 }
 0x1cd   : > { %v3373_v48 = vrot.slane %v943_v20, 2  ;;  %v1078_v2 = vsel %vm398_vm0, %v3368_v41, 0 }
 0x1cf   : > { %v881_v53 = vpop.f32.mrf.mxu1  ;;  %v1102_v0 = vsel %vm398_vm0, %v3373_v48, 0 }
 0x1d0   : > { %v1001_v44 = vld.sshfl [vmem:[#allocation1] sm:$0xff pattern:$0x73625140]  ;;  %v905_v45 = vpack.c.bf16 %v881_v53, %v881_v53 }
 0x1d1   : > { %1023 = vst [vmem:[#allocation1] ss:$4 sm:$0xff] %v3352_v19  ;;  %1003 = vrot.lane.b32.xlu2 %v1001_v44, %s3045_s16 }
 0x1d2   : > { %v921_v55 = vrot.slane %v905_v45, 2 }
 0x1d3   : > { %2796 = vmatmul.msk.bf16.gmra.mxu3 %vm398_vm0, %v779_v46 }
 0x1d4   : > { %v3378_v59 = vsel %vm926_vm14, %v905_v45, %v921_v55  ;;  %v949_v61 = vsel %vm930_vm12, %v905_v45, %v921_v55 }
 0x1d5   : > { %v3383_v62 = vrot.slane %v949_v61, 2  ;;  %v1125_v12 = vsel %vm398_vm0, %v3378_v59, 0 }
 0x1d7   : > { %v1149_v3 = vsel %vm398_vm0, %v3383_v62, 0 }
 0x1d8   : > { %v1024_v49 = vld.sshfl [vmem:[#allocation1] sm:$0xff pattern:$0x73625140] }
 0x1d9   : > { %1047 = vst [vmem:[#allocation1] ss:$4 sm:$0xff] %v3354_v40  ;;  %1026 = vrot.lane.b32.xlu0 %v1024_v49, %s3045_s16 }
 0x1e0   : > { %v1048_v52 = vld.sshfl [vmem:[#allocation1] sm:$0xff pattern:$0x73625140] }
 0x1e1   : > { %1070 = vst [vmem:[#allocation1] ss:$4 sm:$0xff] %v3368_v41  ;;  %1050 = vrot.lane.b32.xlu2 %v1048_v52, %s3045_s16 }
 0x1e8   : > { %v1071_v54 = vld.sshfl [vmem:[#allocation1] sm:$0xff pattern:$0x73625140] }
 0x1e9   : > { %1094 = vst [vmem:[#allocation1] ss:$4 sm:$0xff] %v3373_v48  ;;  %1073 = vrot.lane.b32.xlu1 %v1071_v54, %s3045_s16 }
 0x1f0   : > { %v1095_v56 = vld.sshfl [vmem:[#allocation1] sm:$0xff pattern:$0x73625140] }
 0x1f1   : > { %1117 = vst [vmem:[#allocation1] ss:$4 sm:$0xff] %v3378_v59  ;;  %1097 = vrot.lane.b32.xlu0 %v1095_v56, %s3045_s16 }
 0x1f8   : > { %v1118_v60 = vld.sshfl [vmem:[#allocation1] sm:$0xff pattern:$0x73625140] }
 0x1f9   : > { %1141 = vst [vmem:[#allocation1] ss:$4 sm:$0xff] %v3383_v62  ;;  %1120 = vrot.lane.b32.xlu2 %v1118_v60, %s3045_s16 }
 0x200   : > { %v1142_v63 = vld.sshfl [vmem:[#allocation1] sm:$0xff pattern:$0x73625140] }
 0x201   : > { %1144 = vrot.lane.b32.xlu0 %v1142_v63, %s3045_s16 }
 0x22b   : > { %v1004_v17 = vpop.permute.xlu2 %1003 }
 0x22c   : > { %2798 = vmatmul.msk.bf16.vlgmr.msrb.gmra.mxu3 %vm398_vm0, %v1004_v17  ;;  %v3463_v17 = vpop.f32.mrf.mxu2 }
 0x22d   : > { %1111 = vmatpush.bf16.xpose.msrb.mxu3 %v1102_v0 }
 0x23b   : > { %v980_v26 = vpop.permute.xlu1 %979  ;;  %v1051_v1 = vpop.permute.xlu2 %1050 }
 0x23c   : > { %2797 = vmatmul.msk.bf16.vlgmr.msrb.gmra.mxu2 %vm398_vm0, %v980_v26  ;;  %2800 = vmatmul.msk.bf16.vlgmr.msra.gmra.mxu3 %vm398_vm0, %v1051_v1  ;;  %v3467_v26 = vpop.f32.mrf.mxu2 }
 0x23d   : > { %1087 = vmatpush.bf16.xpose.msrb.mxu2 %v1078_v2  ;;  %1158 = vmatpush.bf16.xpose.msra.mxu3 %v1149_v3 }
 0x246   : > { %v884_v4 = vpop.f32.mrf.mxu3 }
 0x247   : > { %v906_v5 = vpack.c.bf16 %v884_v4, %v884_v4 }
 0x249   : > { %v922_v7 = vrot.slane %v906_v5, 2 }
 0x24b   : > { %v955_v8 = vsel %vm930_vm12, %v906_v5, %v922_v7  ;;  %v1027_v9 = vpop.permute.xlu0 %1026  ;;  %v3399_v10 = vsel %vm926_vm14, %v906_v5, %v922_v7 }
 0x24c   : > { %2799 = vmatmul.msk.bf16.vlgmr.msra.gmra.mxu2 %vm398_vm0, %v1027_v9  ;;  %1164 = vst [vmem:[#allocation1] ss:$4 sm:$0xff] %v3399_v10  ;;  %v1172_v13 = vsel %vm398_vm0, %v3399_v10, 0  ;;  %v3407_v15 = vrot.slane %v955_v8, 2 }
 0x24d   : > { %1134 = vmatpush.bf16.xpose.msra.mxu2 %v1125_v12  ;;  %1181 = vmatpush.bf16.xpose.msrb.mxu0 %v1172_v13 }
 0x24e   : > { %v886_v18 = vpop.f32.mrf.mxu3  ;;  %v1196_v21 = vsel %vm398_vm0, %v3407_v15, 0 }
 0x24f   : > { %1205 = vmatpush.bf16.xpose.msrb.mxu1 %v1196_v21  ;;  %v907_v22 = vpack.c.bf16 %v886_v18, %v886_v18 }
 0x251   : > { %v923_v30 = vrot.slane %v907_v22, 2 }
 0x253   : > { %v1165_v23 = vld.sshfl [vmem:[#allocation1] sm:$0xff pattern:$0x73625140]  ;;  %v3414_v28 = vsel %vm926_vm14, %v907_v22, %v923_v30  ;;  %v961_v39 = vsel %vm930_vm12, %v907_v22, %v923_v30  ;;  %v1121_v50 = vpop.permute.xlu2 %1120 }
 0x254   : > { %1188 = vst [vmem:[#allocation1] ss:$4 sm:$0xff] %v3407_v15  ;;  %1167 = vrot.lane.b32.xlu1 %v1165_v23, %s3045_s16  ;;  %v1219_v37 = vsel %vm398_vm0, %v3414_v28, 0  ;;  %v3432_v57 = vrot.slane %v961_v39, 2 }
 0x256   : > { %v889_v24 = vpop.f32.mrf.mxu3  ;;  %v1243_v46 = vsel %vm398_vm0, %v3432_v57, 0 }
 0x257   : > { %v908_v25 = vpack.c.bf16 %v889_v24, %v889_v24 }
 0x259   : > { %v924_v31 = vrot.slane %v908_v25, 2 }
 0x25b   : > { %v3417_v32 = vsel %vm926_vm14, %v908_v25, %v924_v31  ;;  %v967_v33 = vsel %vm930_vm12, %v908_v25, %v924_v31  ;;  %v1074_v34 = vpop.permute.xlu1 %1073  ;;  %v1189_v35 = vld.sshfl [vmem:[#allocation1] sm:$0xff pattern:$0x73625140] }
 0x25c   : > { %v3420_v36 = vrot.slane %v967_v33, 2  ;;  %1191 = vrot.lane.b32.xlu1 %v1189_v35, %s3045_s16  ;;  %2801 = vmatmul.msk.bf16.vlgmr.msrb.gmra.mxu2 %vm398_vm0, %v1074_v34  ;;  %1211 = vst [vmem:[#allocation1] ss:$4 sm:$0xff] %v3414_v28  ;;  %v1266_v38 = vsel %vm398_vm0, %v3417_v32, 0 }
 0x25d   : > { %1228 = vmatpush.bf16.xpose.msrb.mxu2 %v1219_v37  ;;  %1275 = vmatpush.bf16.xpose.msra.mxu0 %v1266_v38 }
 0x25e   : > { %v891_v42 = vpop.f32.mrf.mxu3  ;;  %v1290_v43 = vsel %vm398_vm0, %v3420_v36, 0 }
 0x25f   : > { %1299 = vmatpush.bf16.xpose.msra.mxu1 %v1290_v43  ;;  %v909_v11 = vpack.c.bf16 %v891_v42, %v891_v42 }
 0x261   : > { %v925_v47 = vrot.slane %v909_v11, 2 }
 0x263   : > { %v1212_v44 = vld.sshfl [vmem:[#allocation1] sm:$0xff pattern:$0x73625140]  ;;  %v1098_v16 = vpop.permute.xlu0 %1097  ;;  %v3440_v49 = vsel %vm926_vm14, %v909_v11, %v925_v47  ;;  %v973_v20 = vsel %vm930_vm12, %v909_v11, %v925_v47 }
 0x264   : > { %1235 = vst [vmem:[#allocation1] ss:$4 sm:$0xff] %v3432_v57  ;;  %2802 = vmatmul.msk.bf16.vlgmr.msrb.gmra.mxu3 %vm398_vm0, %v1098_v16  ;;  %1214 = vrot.lane.b32.xlu2 %v1212_v44, %s3045_s16  ;;  %v1313_v52 = vsel %vm398_vm0, %v3440_v49, 0  ;;  %v3448_v53 = vrot.slane %v973_v20, 2  ;;  %v3533_v20 = vpop.f32.mrf.mxu0 }
 0x265   : > { %1252 = vmatpush.bf16.xpose.msrb.mxu3 %v1243_v46 }
 0x266   : > { %v1337_v55 = vsel %vm398_vm0, %v3448_v53, 0 }
 0x26b   : > { %v1236_v51 = vld.sshfl [vmem:[#allocation1] sm:$0xff pattern:$0x73625140] }
 0x26c   : > { %1238 = vrot.lane.b32.xlu2 %v1236_v51, %s3045_s16  ;;  %1258 = vst [vmem:[#allocation1] ss:$4 sm:$0xff] %v3417_v32  ;;  %2803 = vmatmul.msk.bf16.vlgmr.msra.gmra.mxu2 %vm398_vm0, %v1121_v50 }
 0x26d   : > { %1322 = vmatpush.bf16.xpose.msra.mxu2 %v1313_v52 }
 0x273   : > { %v1145_v54 = vpop.permute.xlu0 %1144  ;;  %v1259_v45 = vld.sshfl [vmem:[#allocation1] sm:$0xff pattern:$0x73625140] }
 0x274   : > { %2804 = vmatmul.msk.bf16.vlgmr.msra.gmra.mxu3 %vm398_vm0, %v1145_v54  ;;  %1261 = vrot.lane.b32.xlu0 %v1259_v45, %s3045_s16  ;;  %1282 = vst [vmem:[#allocation1] ss:$4 sm:$0xff] %v3420_v36 }
 0x275   : > { %1346 = vmatpush.bf16.xpose.msra.mxu3 %v1337_v55 }
 0x27b   : > { %v1283_v56 = vld.sshfl [vmem:[#allocation1] sm:$0xff pattern:$0x73625140] }
 0x27c   : > { %1285 = vrot.lane.b32.xlu0 %v1283_v56, %s3045_s16  ;;  %1305 = vst [vmem:[#allocation1] ss:$4 sm:$0xff] %v3440_v49  ;;  %v3540_v56 = vpop.f32.mrf.mxu0 }
 0x283   : > { %v1306_v61 = vld.sshfl [vmem:[#allocation1] sm:$0xff pattern:$0x73625140] }
 0x284   : > { %1308 = vrot.lane.b32.xlu1 %v1306_v61, %s3045_s16  ;;  %1329 = vst [vmem:[#allocation1] ss:$4 sm:$0xff] %v3448_v53 }
 0x28b   : > { %v1330_v60 = vld.sshfl [vmem:[#allocation1] sm:$0xff pattern:$0x73625140] }
 0x28c   : > { %1332 = vrot.lane.b32.xlu2 %v1330_v60, %s3045_s16  ;;  %1545 = vst [vmem:[#allocation1] ss:$4 sm:$0xff] %v3340_v27 }
 0x293   : > { %v1546_v63 = vld.sshfl [vmem:[#allocation1] sm:$0xff pattern:$0x73625140] }
 0x294   : > { %1548 = vrot.lane.b32.xlu0 %v1546_v63, %s3046_s20  ;;  %1570 = vst [vmem:[#allocation1] ss:$4 sm:$0xff] %v3344_v29  ;;  %v3473_v29 = vpop.f32.mrf.mxu2 }
 0x29b   : > { %v1571_v0 = vld.sshfl [vmem:[#allocation1] sm:$0xff pattern:$0x73625140] }
 0x29c   : > { %1573 = vrot.lane.b32.xlu1 %v1571_v0, %s3046_s20  ;;  %1594 = vst [vmem:[#allocation1] ss:$4 sm:$0xff] %v3352_v19  ;;  %v3479_v19 = vpop.f32.mrf.mxu2 }
 0x2a3   : > { %v1595_v1 = vld.sshfl [vmem:[#allocation1] sm:$0xff pattern:$0x73625140] }
 0x2a4   : > { %1597 = vrot.lane.b32.xlu1 %v1595_v1, %s3046_s20  ;;  %1618 = vst [vmem:[#allocation1] ss:$4 sm:$0xff] %v3354_v40  ;;  %v3547_v1 = vpop.f32.mrf.mxu0 }
 0x2ab   : > { %v1619_v27 = vld.sshfl [vmem:[#allocation1] sm:$0xff pattern:$0x73625140] }
 0x2ac   : > { %1621 = vrot.lane.b32.xlu1 %v1619_v27, %s3046_s20  ;;  %1642 = vst [vmem:[#allocation1] ss:$4 sm:$0xff] %v3368_v41 }
 0x2af   : > { %v3475_v2 = vpop.f32.mrf.mxu3 }
 0x2b0   : > { %v1356_v45 = vsel %vm1352_vm15, %v3475_v2, -inf }
 0x2b3   : > { %v1643_v3 = vld.sshfl [vmem:[#allocation1] sm:$0xff pattern:$0x73625140] }
 0x2b4   : > { %1645 = vrot.lane.b32.xlu2 %v1643_v3, %s3046_s20  ;;  %1666 = vst [vmem:[#allocation1] ss:$4 sm:$0xff] %v3373_v48 }
 0x2b7   : > { %v1021_v4 = vpop.f32.mrf.mxu3 }
 0x2bb   : > { %v1667_v5 = vld.sshfl [vmem:[#allocation1] sm:$0xff pattern:$0x73625140] }
 0x2bc   : > { %1669 = vrot.lane.b32.xlu0 %v1667_v5, %s3046_s20  ;;  %1690 = vst [vmem:[#allocation1] ss:$4 sm:$0xff] %v3378_v59  ;;  %v3552_v5 = vpop.f32.mrf.mxu0 }
 0x2be   : > { %v1215_v40 = vpop.permute.xlu2 %1214 }
 0x2bf   : > { %v3483_v7 = vpop.f32.mrf.mxu2  ;;  %v3485_v41 = vpop.f32.mrf.mxu3  ;;  %2807 = vmatmul.msk.bf16.vlgmr.msrb.gmra.mxu2 %vm398_vm0, %v1215_v40 }
 0x2c0   : > { %v1353_v52 = vsel %vm1352_vm15, %v3483_v7, -inf  ;;  %v1362_v60 = vsel %vm1352_vm15, %v3485_v41, -inf }
 0x2c3   : > { %v1691_v8 = vld.sshfl [vmem:[#allocation1] sm:$0xff pattern:$0x73625140] }
 0x2c4   : > { %1693 = vrot.lane.b32.xlu0 %v1691_v8, %s3046_s20  ;;  %1714 = vst [vmem:[#allocation1] ss:$4 sm:$0xff] %v3383_v62 }
 0x2c6   : > { %v1168_v48 = vpop.permute.xlu1 %1167  ;;  %v1239_v9 = vpop.permute.xlu2 %1238 }
 0x2c7   : > { %v997_v12 = vpop.f32.mrf.mxu2  ;;  %v1068_v13 = vpop.f32.mrf.mxu3  ;;  %2805 = vmatmul.msk.bf16.vlgmr.msrb.gmra.mxu0 %vm398_vm0, %v1168_v48  ;;  %2808 = vmatmul.msk.bf16.vlgmr.msrb.gmra.mxu3 %vm398_vm0, %v1239_v9 }
 0x2cb   : > { %v1715_v59 = vld.sshfl [vmem:[#allocation1] sm:$0xff pattern:$0x73625140] }
 0x2cc   : > { %1717 = vrot.lane.b32.xlu0 %v1715_v59, %s3046_s20  ;;  %1738 = vst [vmem:[#allocation1] ss:$4 sm:$0xff] %v3399_v10 }
 0x2ce   : > { %v1192_v18 = vpop.permute.xlu1 %1191 }
 0x2cf   : > { %v3494_v21 = vpop.f32.mrf.mxu2  ;;  %2806 = vmatmul.msk.bf16.vlgmr.msrb.gmra.mxu1 %vm398_vm0, %v1192_v18 }
 0x2d0   : > { %v1359_v55 = vsel %vm1352_vm15, %v3494_v21, -inf }
 0x2d3   : > { %v1739_v22 = vld.sshfl [vmem:[#allocation1] sm:$0xff pattern:$0x73625140] }
 0x2d4   : > { %1741 = vrot.lane.b32.xlu2 %v1739_v22, %s3046_s20  ;;  %1762 = vst [vmem:[#allocation1] ss:$4 sm:$0xff] %v3407_v15 }
 0x2d7   : > { %v1044_v62 = vpop.f32.mrf.mxu2 }
 0x2db   : > { %v1763_v23 = vld.sshfl [vmem:[#allocation1] sm:$0xff pattern:$0x73625140] }
 0x2dc   : > { %1765 = vrot.lane.b32.xlu2 %v1763_v23, %s3046_s20  ;;  %1786 = vst [vmem:[#allocation1] ss:$4 sm:$0xff] %v3414_v28 }
 0x2df   : > { %v3501_v30 = vpop.f32.mrf.mxu2 }
 0x2e3   : > { %v1787_v24 = vld.sshfl [vmem:[#allocation1] sm:$0xff pattern:$0x73625140] }
 0x2e4   : > { %1789 = vrot.lane.b32.xlu2 %v1787_v24, %s3046_s20  ;;  %1810 = vst [vmem:[#allocation1] ss:$4 sm:$0xff] %v3432_v57 }
 0x2e6   : > { %v1262_v10 = vpop.permute.xlu0 %1261  ;;  %v1333_v25 = vpop.permute.xlu2 %1332 }
 0x2e7   : > { %v1091_v31 = vpop.f32.mrf.mxu2  ;;  %v3505_v33 = vpop.f32.mrf.mxu3  ;;  %2809 = vmatmul.msk.bf16.vlgmr.msra.gmra.mxu0 %vm398_vm0, %v1262_v10  ;;  %2812 = vmatmul.msk.bf16.vlgmr.msra.gmra.mxu3 %vm398_vm0, %v1333_v25 }
 0x2e8   : > { %v1368_v61 = vsel %vm1352_vm15, %v3505_v33, -inf }
 0x2eb   : > { %v3509_v15 = vld.sshfl [vmem:[#allocation1] sm:$0xff pattern:$0x73625140] }
 0x2ec   : > { %1834 = vst [vmem:[#allocation1] ss:$4 sm:$0xff] %v3417_v32 }
 0x2ee   : > { %v1286_v28 = vpop.permute.xlu0 %1285 }
 0x2ef   : > { %v1115_v34 = vpop.f32.mrf.mxu3  ;;  %v3512_v35 = vpop.f32.mrf.mxu2  ;;  %2810 = vmatmul.msk.bf16.vlgmr.msra.gmra.mxu1 %vm398_vm0, %v1286_v28 }
 0x2f0   : > { %v1371_v27 = vsel %vm1352_vm15, %v3512_v35, -inf }
 0x2f3   : > { %v1835_v37 = vld.sshfl [vmem:[#allocation1] sm:$0xff pattern:$0x73625140] }
 0x2f4   : > { %1837 = vrot.lane.b32.xlu1 %v1835_v37, %s3046_s20  ;;  %1858 = vst [vmem:[#allocation1] ss:$4 sm:$0xff] %v3420_v36  ;;  %v1365_v36 = vsel %vm1352_vm15, %v3501_v30, -inf }
 0x2f6   : > { %v1309_v38 = vpop.permute.xlu1 %1308 }
 0x2f7   : > { %v1138_v39 = vpop.f32.mrf.mxu2  ;;  %v3517_v42 = vpop.f32.mrf.mxu3  ;;  %2811 = vmatmul.msk.bf16.vlgmr.msra.gmra.mxu2 %vm398_vm0, %v1309_v38 }
 0x2f8   : > { %v1374_v40 = vsel %vm1352_vm15, %v3517_v42, -inf }
 0x2fb   : > { %v1859_v43 = vld.sshfl [vmem:[#allocation1] sm:$0xff pattern:$0x73625140] }
 0x2fc   : > { %1861 = vrot.lane.b32.xlu0 %v1859_v43, %s3046_s20  ;;  %1882 = vst [vmem:[#allocation1] ss:$4 sm:$0xff] %v3440_v49 }
 0x2ff   : > { %v1162_v32 = vpop.f32.mrf.mxu3 }
 0x303   : > { %v3522_v57 = vld.sshfl [vmem:[#allocation1] sm:$0xff pattern:$0x73625140] }
 0x304   : > { %1906 = vst [vmem:[#allocation1] ss:$4 sm:$0xff] %v3448_v53 }
 0x306   : > { %v1549_v11 = vpop.permute.xlu0 %1548 }
 0x307   : > { %v1555_v44 = vsel %vm926_vm14, %v1549_v11, 0 }
 0x308   : > { %1564 = vmatpush.bf16.msrb.mxu0 %v1555_v44 }
 0x30d   : > { %1366 = vmax.xlane.f32.xlu2 %v1365_v36 }
 0x30e   : > { %v1574_v16 = vpop.permute.xlu1 %1573  ;;  %v1646_v46 = vpop.permute.xlu2 %1645 }
 0x30f   : > { %v1579_v47 = vsel %vm926_vm14, %v1574_v16, 0  ;;  %v1651_v49 = vsel %vm926_vm14, %v1646_v46, 0 }
 0x310   : > { %1588 = vmatpush.bf16.msrb.mxu1 %v1579_v47  ;;  %1660 = vmatpush.bf16.msra.mxu0 %v1651_v49 }
 0x316   : > { %v1598_v50 = vpop.permute.xlu1 %1597 }
 0x317   : > { %v1603_v51 = vsel %vm926_vm14, %v1598_v50, 0 }
 0x318   : > { %1612 = vmatpush.bf16.msrb.mxu2 %v1603_v51 }
 0x31e   : > { %v1622_v53 = vpop.permute.xlu1 %1621  ;;  %1354 = vmax.xlane.f32.xlu1 %v1353_v52 }
 0x31f   : > { %v1627_v54 = vsel %vm926_vm14, %v1622_v53, 0 }
 0x320   : > { %1636 = vmatpush.bf16.msrb.mxu3 %v1627_v54 }
 0x326   : > { %1357 = vmax.xlane.f32.xlu0 %v1356_v45  ;;  %1360 = vmax.xlane.f32.xlu1 %v1359_v55 }
 0x32e   : > { %v1670_v63 = vpop.permute.xlu0 %1669  ;;  %1369 = vmax.xlane.f32.xlu0 %v1368_v61  ;;  %1363 = vmax.xlane.f32.xlu1 %v1362_v60  ;;  %v3573_v28 = vpop.permute.xlu2 %1741 }
 0x32f   : > { %v1675_v0 = vsel %vm926_vm14, %v1670_v63, 0 }
 0x330   : > { %1684 = vmatpush.bf16.msra.mxu1 %v1675_v0 }
 0x336   : > { %v1694_v3 = vpop.permute.xlu0 %1693  ;;  %1372 = vmax.xlane.f32.xlu0 %v1371_v27  ;;  %v3585_v11 = vpop.permute.xlu2 %1765 }
 0x337   : > { %v1699_v4 = vsel %vm926_vm14, %v1694_v3, 0 }
 0x338   : > { %1708 = vmatpush.bf16.msra.mxu2 %v1699_v4 }
 0x33e   : > { %v1718_v8 = vpop.permute.xlu0 %1717  ;;  %1375 = vmax.xlane.f32.xlu0 %v1374_v40  ;;  %v3587_v16 = vpop.permute.xlu2 %1789 }
 0x33f   : > { %v1723_v48 = vsel %vm926_vm14, %v1718_v8, 0 }
 0x340   : > { %1732 = vmatpush.bf16.msra.mxu3 %v1723_v48 }
 0x342   : > { %v3557_v9 = vpop.f32.mrf.mxu2 }
 0x343   : > { %v1383_v31 = vsel %vm1352_vm15, %v3557_v9, -inf }
 0x344   : > { %v3559_v12 = vpop.f32.mrf.mxu0 }
 0x345   : > { %v1377_v13 = vsel %vm1352_vm15, %v3559_v12, -inf }
 0x346   : > { %1378 = vmax.xlane.f32.xlu2 %v1377_v13 }
 0x34a   : > { %v1232_v59 = vpop.f32.mrf.mxu2  ;;  %v3563_v18 = vpop.f32.mrf.mxu3 }
 0x34b   : > { %v1386_v22 = vsel %vm1352_vm15, %v3563_v18, -inf }
 0x34c   : > { %v1185_v62 = vpop.f32.mrf.mxu0  ;;  %v3567_v23 = vpop.f32.mrf.mxu1  ;;  %1387 = vmax.xlane.f32.xlu1 %v1386_v22 }
 0x34d   : > { %v1380_v24 = vsel %vm1352_vm15, %v3567_v23, -inf }
 0x34e   : > { %1381 = vmax.xlane.f32.xlu2 %v1380_v24 }
 0x352   : > { %v1256_v10 = vpop.f32.mrf.mxu3 }
 0x354   : > { %v1209_v25 = vpop.f32.mrf.mxu1 }
 0x356   : > { %1384 = vmax.xlane.f32.xlu2 %v1383_v31 }
 0x364   : > { %v3575_v34 = vpop.f32.mrf.mxu0 }
 0x365   : > { %v1389_v37 = vsel %vm1352_vm15, %v3575_v34, -inf }
 0x366   : > { %1390 = vmax.xlane.f32.xlu1 %v1389_v37  ;;  %v3596_v54 = vpop.permute.xlu1 %1837 }
 0x36a   : > { %v3579_v38 = vpop.f32.mrf.mxu3 }
 0x36b   : > { %v1398_v53 = vsel %vm1352_vm15, %v3579_v38, -inf }
 0x36c   : > { %v1279_v39 = vpop.f32.mrf.mxu0  ;;  %v3581_v43 = vpop.f32.mrf.mxu1 }
 0x36d   : > { %v1392_v32 = vsel %vm1352_vm15, %v3581_v43, -inf }
 0x36e   : > { %1393 = vmax.xlane.f32.xlu2 %v1392_v32  ;;  %v3602_v61 = vpop.permute.xlu0 %1861 }
 0x372   : > { %v1350_v44 = vpop.f32.mrf.mxu3 }
 0x374   : > { %v1303_v36 = vpop.f32.mrf.mxu1 }
 0x37a   : > { %v3589_v46 = vpop.f32.mrf.mxu2 }
 0x37b   : > { %v1395_v47 = vsel %vm1352_vm15, %v3589_v46, -inf }
 0x37c   : > { %1396 = vmax.xlane.f32.xlu2 %v1395_v47 }
 0x380   : > { %v1367_v49 = vpop.xlane.xlu2 %1366 }
 0x381   : > { %v1405_v50 = vsub.f32 %v3501_v30, %v1367_v49 }
 0x382   : > { %v1326_v51 = vpop.f32.mrf.mxu2 }
 0x383   : > { %v1425_v52 = vmul.f32 1.442695, %v1405_v50 }
 0x384   : > { %1399 = vmax.xlane.f32.xlu2 %v1398_v53 }
 0x385   : > { %2914 = vpow2.f32 %v1425_v52 }
 0x38b   : > { %v3598_v45 = vpop.eup %2914 }
 0x38c   : > { %v1461_v55 = vsel %vm1352_vm15, %v3598_v45, 0.0 }
 0x38d   : > { %1462 = vadd.xlane.f32.xlu2 %v1461_v55 }
 0x391   : > { %v1355_v60 = vpop.xlane.xlu1 %1354 }
 0x392   : > { %v1401_v30 = vsub.f32 %v3483_v7, %v1355_v60 }
 0x394   : > { %v1417_v63 = vmul.f32 1.442695, %v1401_v30 }
 0x396   : > { %2916 = vpow2.f32 %v1417_v63 }
 0x399   : > { %v1358_v0 = vpop.xlane.xlu0 %1357  ;;  %v1361_v27 = vpop.xlane.xlu1 %1360 }
 0x39a   : > { %v1402_v3 = vsub.f32 %v3475_v2, %v1358_v0  ;;  %v1403_v4 = vsub.f32 %v3494_v21, %v1361_v27 }
 0x39c   : > { %v3607_v40 = vpop.eup %2916  ;;  %v1419_v8 = vmul.f32 1.442695, %v1402_v3  ;;  %v1421_v48 = vmul.f32 1.442695, %v1403_v4 }
 0x39d   : > { %v1449_v13 = vsel %vm1352_vm15, %v3607_v40, 0.0 }
 0x39e   : > { %2918 = vpow2.f32 %v1419_v8  ;;  %1450 = vadd.xlane.f32.xlu1 %v1449_v13 }
 0x39f   : > { %2920 = vpow2.f32 %v1421_v48 }
 0x3a1   : > { %v1370_v59 = vpop.xlane.xlu0 %1369  ;;  %v1364_v7 = vpop.xlane.xlu1 %1363 }
 0x3a2   : > { %v1406_v22 = vsub.f32 %v3505_v33, %v1370_v59  ;;  %v1404_v62 = vsub.f32 %v3485_v41, %v1364_v7 }
 0x3a4   : > { %v3613_v24 = vpop.eup %2918  ;;  %v1427_v2 = vmul.f32 1.442695, %v1406_v22  ;;  %v1423_v21 = vmul.f32 1.442695, %v1404_v62 }
 0x3a5   : > { %v3615_v10 = vpop.eup %2920  ;;  %1885 = vrot.lane.b32.xlu2 %v3522_v57, %s3046_s20  ;;  %v1452_v25 = vsel %vm1352_vm15, %v3613_v24, 0.0 }
 0x3a6   : > { %2922 = vpow2.f32 %v1427_v2  ;;  %1453 = vadd.xlane.f32.xlu1 %v1452_v25  ;;  %v1455_v31 = vsel %vm1352_vm15, %v3615_v10, 0.0 }
 0x3a7   : > { %2924 = vpow2.f32 %v1423_v21  ;;  %1456 = vadd.xlane.f32.xlu0 %v1455_v31 }
 0x3a9   : > { %v1373_v41 = vpop.xlane.xlu0 %1372 }
 0x3aa   : > { %v1407_v33 = vsub.f32 %v3512_v35, %v1373_v41 }
 0x3ac   : > { %v3624_v37 = vpop.eup %2922  ;;  %v1429_v39 = vmul.f32 1.442695, %v1407_v33 }
 0x3ad   : > { %v3626_v32 = vpop.eup %2924  ;;  %v1464_v57 = vsel %vm1352_vm15, %v3624_v37, 0.0 }
 0x3ae   : > { %2926 = vpow2.f32 %v1429_v39  ;;  %1465 = vadd.xlane.f32.xlu1 %v1464_v57  ;;  %v1458_v44 = vsel %vm1352_vm15, %v3626_v32, 0.0 }
 0x3af   : > { %1459 = vadd.xlane.f32.xlu0 %v1458_v44  ;;  %v895_v44 = vpack.c.bf16 %v3540_v56, %v3540_v56  ;;  %v897_v56 = vpack.c.bf16 %v3552_v5, %v3552_v5  ;;  %v898_v5 = vpack.c.bf16 %v3463_v17, %v3463_v17 }
 0x3b1   : > { %v1376_v48 = vpop.xlane.xlu0 %1375 }
 0x3b2   : > { %v1408_v13 = vsub.f32 %v3517_v42, %v1376_v48 }
 0x3b4   : > { %v3632_v36 = vpop.eup %2926  ;;  %v1431_v22 = vmul.f32 1.442695, %v1408_v13 }
 0x3b5   : > { %v1467_v47 = vsel %vm1352_vm15, %v3632_v36, 0.0 }
 0x3b7   : > { %1468 = vadd.xlane.f32.xlu0 %v1467_v47 }
 0x3b9   : > { %v1379_v35 = vpop.xlane.xlu2 %1378 }
 0x3ba   : > { %v1409_v49 = vsub.f32 %v3559_v12, %v1379_v35 }
 0x3bc   : > { %v1433_v50 = vmul.f32 1.442695, %v1409_v49 }
 0x3be   : > { %2928 = vpow2.f32 %v1433_v50  ;;  %v1933_v50 = vunpack.c.l.b16 %v895_v44 }
 0x3bf   : > { %v1388_v27 = vpop.xlane.xlu1 %1387 }
 0x3c1   : > { %v1382_v51 = vpop.xlane.xlu2 %1381 }
 0x3c2   : > { %v1410_v52 = vsub.f32 %v3567_v23, %v1382_v51 }
 0x3c4   : > { %v3638_v53 = vpop.eup %2928  ;;  %v1435_v55 = vmul.f32 1.442695, %v1410_v52 }
 0x3c5   : > { %v1473_v60 = vsel %vm1352_vm15, %v3638_v53, 0.0 }
 0x3c6   : > { %2930 = vpow2.f32 %v1435_v55  ;;  %1474 = vadd.xlane.f32.xlu0 %v1473_v60  ;;  %v896_v55 = vpack.c.bf16 %v3547_v1, %v3547_v1  ;;  %v1960_v60 = vunpack.c.l.b16 %v897_v56  ;;  %v1907_v1 = vld.sshfl [vmem:[#allocation1] sm:$0xff pattern:$0x73625140] }
 0x3c7   : > { %1813 = vrot.lane.b32.xlu1 %v3509_v15, %s3046_s20 }
 0x3c9   : > { %v1385_v30 = vpop.xlane.xlu2 %1384 }
 0x3ca   : > { %v1411_v63 = vsub.f32 %v3557_v9, %v1385_v30  ;;  %v1959_v30 = vunpack.c.l.b16 %v896_v55  ;;  %v1843_v55 = vsel %vm926_vm14, %v3596_v54, 0 }
 0x3cc   : > { %v3645_v12 = vpop.eup %2930  ;;  %v1437_v0 = vmul.f32 1.442695, %v1411_v63  ;;  %v3692_v63 = vpack.c.b16 %v1960_v60, %v1959_v30 }
 0x3cd   : > { %v1476_v23 = vsel %vm1352_vm15, %v3645_v12, 0.0 }
 0x3ce   : > { %2932 = vpow2.f32 %v1437_v0  ;;  %1477 = vadd.xlane.f32.xlu0 %v1476_v23 }
 0x3d4   : > { %v3649_v3 = vpop.eup %2932 }
 0x3d5   : > { %v1479_v4 = vsel %vm1352_vm15, %v3649_v3, 0.0 }
 0x3d6   : > { %1480 = vadd.xlane.f32.xlu0 %v1479_v4  ;;  %v900_v4 = vpack.c.bf16 %v3473_v29, %v3473_v29 }
 0x3d9   : > { %v1391_v8 = vpop.xlane.xlu1 %1390 }
 0x3da   : > { %v1413_v15 = vsub.f32 %v3575_v34, %v1391_v8  ;;  %v1412_v34 = vsub.f32 %v3563_v18, %v1388_v27  ;;  %v899_v27 = vpack.c.bf16 %v3467_v26, %v3467_v26 }
 0x3dc   : > { %v1441_v9 = vmul.f32 1.442695, %v1413_v15  ;;  %v1439_v25 = vmul.f32 1.442695, %v1412_v34  ;;  %v2013_v15 = vunpack.c.l.b16 %v900_v4 }
 0x3de   : > { %2934 = vpow2.f32 %v1441_v9  ;;  %v1986_v9 = vunpack.c.l.b16 %v898_v5 }
 0x3e1   : > { %v1394_v59 = vpop.xlane.xlu2 %1393 }
 0x3e2   : > { %v1414_v7 = vsub.f32 %v3581_v43, %v1394_v59 }
 0x3e4   : > { %v3656_v62 = vpop.eup %2934  ;;  %v1443_v2 = vmul.f32 1.442695, %v1414_v7 }
 0x3e5   : > { %v1485_v21 = vsel %vm1352_vm15, %v3656_v62, 0.0 }
 0x3e6   : > { %2936 = vpow2.f32 %v1443_v2  ;;  %1486 = vadd.xlane.f32.xlu2 %v1485_v21 }
 0x3e7   : > { %2938 = vpow2.f32 %v1431_v22 }
 0x3e8   : > { %2940 = vpow2.f32 %v1439_v25 }
 0x3ec   : > { %v3661_v31 = vpop.eup %2936 }
 0x3ed   : > { %v3663_v41 = vpop.eup %2938  ;;  %v1488_v42 = vsel %vm1352_vm15, %v3661_v31, 0.0 }
 0x3ee   : > { %1489 = vadd.xlane.f32.xlu0 %v1488_v42  ;;  %v1470_v39 = vsel %vm1352_vm15, %v3663_v41, 0.0  ;;  %v3670_v18 = vpop.eup %2940 }
 0x3ef   : > { %v1397_v43 = vpop.xlane.xlu2 %1396  ;;  %v1482_v47 = vsel %vm1352_vm15, %v3670_v18, 0.0 }
 0x3f0   : > { %v1415_v33 = vsub.f32 %v3589_v46, %v1397_v43  ;;  %v894_v46 = vpack.c.bf16 %v3533_v20, %v3533_v20  ;;  %v901_v20 = vpack.c.bf16 %v3479_v19, %v3479_v19  ;;  %v1987_v19 = vunpack.c.l.b16 %v899_v27 }
 0x3f1   : > { %1471 = vadd.xlane.f32.xlu1 %v1470_v39 }
 0x3f2   : > { %v1445_v57 = vmul.f32 1.442695, %v1415_v33  ;;  %v1932_v51 = vunpack.c.l.b16 %v894_v46  ;;  %v2014_v8 = vunpack.c.l.b16 %v901_v20  ;;  %v3709_v17 = vpack.c.b16 %v1987_v19, %v1986_v9 }
 0x3f4   : > { %2942 = vpow2.f32 %v1445_v57  ;;  %v3682_v52 = vpack.c.b16 %v1933_v50, %v1932_v51  ;;  %v3703_v13 = vpack.c.b16 %v2014_v8, %v2013_v15 }
 0x3f6   : > { %v1941_v8 = vsel %vm398_vm0, %v3682_v52, 0 }
 0x3f7   : > { %v1400_v0 = vpop.xlane.xlu2 %1399 }
 0x3f8   : > { %v1416_v59 = vsub.f32 %v3579_v38, %v1400_v0 }
 0x3f9   : > { %1483 = vadd.xlane.f32.xlu1 %v1482_v47  ;;  %v1795_v47 = vsel %vm926_vm14, %v3587_v16, 0 }
 0x3fa   : > { %v3676_v35 = vpop.eup %2942  ;;  %v1447_v38 = vmul.f32 1.442695, %v1416_v59 }
 0x3fb   : > { %v1491_v49 = vsel %vm1352_vm15, %v3676_v35, 0.0 }
 0x3fc   : > { %1492 = vadd.xlane.f32.xlu2 %v1491_v49 }
 0x400   : > { %v1463_v22 = vpop.xlane.xlu2 %1462 }
 0x402   : > { %1935 = vrot.lane.b32.xlu0 %v3682_v52, %s3045_s16 }
 0x408   : > { %v1886_v30 = vpop.permute.xlu2 %1885 }
 0x409   : > { %v1891_v54 = vsel %vm926_vm14, %v1886_v30, 0 }
 0x411   : > { %v1451_v23 = vpop.xlane.xlu1 %1450 }
 0x412   : > { %2944 = vrcp.f32 %v1451_v23  ;;  %1962 = vrot.lane.b32.xlu1 %v3692_v63, %s3045_s16  ;;  %v1867_v23 = vsel %vm926_vm14, %v3602_v61, 0 }
 0x414   : > { %1909 = vrot.lane.b32.xlu2 %v1907_v1, %s3046_s20 }
 0x418   : > { %v2945_v48 = vpop.eup %2944 }
 0x419   : > { %v1513_v26 = vmul.f32 %v2945_v48, %v3607_v40  ;;  %v1454_v29 = vpop.xlane.xlu1 %1453  ;;  %v1747_v40 = vsel %vm926_vm14, %v3573_v28, 0  ;;  %v1771_v28 = vsel %vm926_vm14, %v3585_v11, 0 }
 0x41a   : > { %2946 = vrcp.f32 %v1454_v29  ;;  %v1457_v7 = vpop.xlane.xlu0 %1456  ;;  %2016 = vrot.lane.b32.xlu1 %v3703_v13, %s3045_s16 }
 0x41b   : > { %v1529_v2 = vpack.c.bf16 %v1513_v26, %v1513_v26  ;;  %2948 = vrcp.f32 %v1457_v7  ;;  %v1995_v7 = vsel %vm398_vm0, %v3709_v17, 0 }
 0x41c   : > { %1989 = vrot.lane.b32.xlu2 %v3709_v17, %s3045_s16  ;;  %2950 = vrcp.f32 %v1463_v22 }
 0x41d   : > { %2813 = vmatmul.msk.bf16.vlgmr.msrb.gmra.mxu0 %vm1550_vm1, %v1529_v2  ;;  %2952 = vpow2.f32 %v1447_v38 }
 0x41e   : > { %1756 = vmatpush.bf16.msrb.mxu0 %v1747_v40 }
 0x420   : > { %v2947_v21 = vpop.eup %2946 }
 0x421   : > { %v2949_v34 = vpop.eup %2948  ;;  %v1514_v25 = vmul.f32 %v2947_v21, %v3613_v24  ;;  %v1466_v39 = vpop.xlane.xlu1 %1465 }
 0x422   : > { %v1515_v42 = vmul.f32 %v2949_v34, %v3615_v10  ;;  %v1460_v43 = vpop.xlane.xlu0 %1459  ;;  %v2951_v57 = vpop.eup %2950 }
 0x423   : > { %v1530_v33 = vpack.c.bf16 %v1514_v25, %v1514_v25  ;;  %2954 = vrcp.f32 %v1460_v43  ;;  %v1517_v24 = vmul.f32 %v2951_v57, %v3598_v45  ;;  %v3725_v10 = vpop.eup %2952 }
 0x424   : > { %v1531_v44 = vpack.c.bf16 %v1515_v42, %v1515_v42  ;;  %2956 = vrcp.f32 %v1466_v39  ;;  %v1494_v11 = vsel %vm1352_vm15, %v3725_v10, 0.0 }
 0x425   : > { %2814 = vmatmul.msk.bf16.vlgmr.msrb.gmra.mxu1 %vm1550_vm1, %v1530_v33  ;;  %v1533_v51 = vpack.c.bf16 %v1517_v24, %v1517_v24 }
 0x426   : > { %2815 = vmatmul.msk.bf16.vlgmr.msrb.gmra.mxu2 %vm1550_vm1, %v1531_v44  ;;  %1780 = vmatpush.bf16.msrb.mxu1 %v1771_v28 }
 0x427   : > { %1804 = vmatpush.bf16.msrb.mxu2 %v1795_v47 }
 0x429   : > { %v2955_v46 = vpop.eup %2954 }
 0x42a   : > { %v1516_v49 = vmul.f32 %v2955_v46, %v3626_v32  ;;  %v1469_v50 = vpop.xlane.xlu0 %1468  ;;  %v2957_v56 = vpop.eup %2956 }
 0x42b   : > { %2958 = vrcp.f32 %v1469_v50  ;;  %v1518_v45 = vmul.f32 %v2957_v56, %v3624_v37  ;;  %v2022_v50 = vsel %vm398_vm0, %v3703_v13, 0 }
 0x42c   : > { %v1532_v16 = vpack.c.bf16 %v1516_v49, %v1516_v49  ;;  %1495 = vadd.xlane.f32.xlu0 %v1494_v11 }
 0x42d   : > { %2817 = vmatmul.msk.bf16.vlgmr.msra.gmra.mxu0 %vm1550_vm1, %v1533_v51  ;;  %v1534_v20 = vpack.c.bf16 %v1518_v45, %v1518_v45 }
 0x42e   : > { %2816 = vmatmul.msk.bf16.vlgmr.msrb.gmra.mxu3 %vm1550_vm1, %v1532_v16  ;;  %1852 = vmatpush.bf16.msra.mxu0 %v1843_v55 }
 0x431   : > { %v2959_v32 = vpop.eup %2958 }
 0x432   : > { %v1519_v60 = vmul.f32 %v2959_v32, %v3632_v36 }
 0x434   : > { %v1535_v0 = vpack.c.bf16 %v1519_v60, %v1519_v60 }
 0x435   : > { %2818 = vmatmul.msk.bf16.vlgmr.msra.gmra.mxu1 %vm1550_vm1, %v1534_v20 }
 0x436   : > { %2819 = vmatmul.msk.bf16.vlgmr.msra.gmra.mxu2 %vm1550_vm1, %v1535_v0  ;;  %1876 = vmatpush.bf16.msra.mxu1 %v1867_v23 }
 0x437   : > { %1900 = vmatpush.bf16.msra.mxu2 %v1891_v54 }
 0x439   : > { %v1814_v27 = vpop.permute.xlu1 %1813  ;;  %v1475_v4 = vpop.xlane.xlu0 %1474 }
 0x43a   : > { %v1819_v37 = vsel %vm926_vm14, %v1814_v27, 0  ;;  %2960 = vrcp.f32 %v1475_v4 }
 0x43b   : > { %1828 = vmatpush.bf16.msrb.mxu3 %v1819_v37 }
 0x440   : > { %v2961_v36 = vpop.eup %2960 }
 0x441   : > { %v1521_v1 = vmul.f32 %v2961_v36, %v3638_v53  ;;  %v1478_v5 = vpop.xlane.xlu0 %1477  ;;  %v1968_v53 = vsel %vm398_vm0, %v3692_v63, 0 }
 0x442   : > { %2962 = vrcp.f32 %v1478_v5 }
 0x443   : > { %v1537_v61 = vpack.c.bf16 %v1521_v1, %v1521_v1 }
 0x445   : > { %2821 = vmatmul.msk.bf16.vlgmr.msrb.gmra.mxu0 %vm1550_vm1, %v1537_v61 }
 0x446   : > { %1950 = vmatpush.bf16.xpose.msrb.mxu0 %v1941_v8 }
 0x448   : > { %v2963_v19 = vpop.eup %2962 }
 0x449   : > { %v1522_v15 = vmul.f32 %v2963_v19, %v3645_v12  ;;  %v1481_v48 = vpop.xlane.xlu0 %1480 }
 0x44a   : > { %2964 = vrcp.f32 %v1481_v48 }
 0x44b   : > { %v1538_v9 = vpack.c.bf16 %v1522_v15, %v1522_v15 }
 0x44d   : > { %2822 = vmatmul.msk.bf16.vlgmr.msrb.gmra.mxu1 %vm1550_vm1, %v1538_v9 }
 0x44e   : > { %1977 = vmatpush.bf16.xpose.msrb.mxu1 %v1968_v53 }
 0x450   : > { %v2965_v26 = vpop.eup %2964 }
 0x451   : > { %v1523_v29 = vmul.f32 %v2965_v26, %v3649_v3 }
 0x453   : > { %v1539_v59 = vpack.c.bf16 %v1523_v29, %v1523_v29 }
 0x455   : > { %2823 = vmatmul.msk.bf16.vlgmr.msrb.gmra.mxu2 %vm1550_vm1, %v1539_v59 }
 0x456   : > { %2004 = vmatpush.bf16.xpose.msrb.mxu2 %v1995_v7 }
 0x459   : > { %v1487_v12 = vpop.xlane.xlu2 %1486 }
 0x45a   : > { %2966 = vrcp.f32 %v1487_v12 }
 0x460   : > { %v2967_v22 = vpop.eup %2966 }
 0x461   : > { %v1525_v2 = vmul.f32 %v2967_v22, %v3656_v62  ;;  %v1490_v40 = vpop.xlane.xlu0 %1489 }
 0x462   : > { %2968 = vrcp.f32 %v1490_v40 }
 0x463   : > { %v1541_v38 = vpack.c.bf16 %v1525_v2, %v1525_v2 }
 0x464   : > { %v1472_v21 = vpop.xlane.xlu1 %1471 }
 0x465   : > { %2970 = vrcp.f32 %v1472_v21  ;;  %2825 = vmatmul.msk.bf16.vlgmr.msra.gmra.mxu0 %vm1550_vm1, %v1541_v38 }
 0x468   : > { %v2969_v3 = vpop.eup %2968 }
 0x469   : > { %v1526_v34 = vmul.f32 %v2969_v3, %v3661_v31 }
 0x46b   : > { %v2971_v25 = vpop.eup %2970  ;;  %v1542_v42 = vpack.c.bf16 %v1526_v34, %v1526_v34 }
 0x46c   : > { %v1520_v43 = vmul.f32 %v2971_v25, %v3663_v41  ;;  %v1484_v39 = vpop.xlane.xlu1 %1483 }
 0x46d   : > { %2826 = vmatmul.msk.bf16.vlgmr.msra.gmra.mxu1 %vm1550_vm1, %v1542_v42 }
 0x46e   : > { %v1536_v33 = vpack.c.bf16 %v1520_v43, %v1520_v43 }
 0x46f   : > { %v1493_v57 = vpop.xlane.xlu2 %1492 }
 0x470   : > { %2972 = vrcp.f32 %v1493_v57  ;;  %2820 = vmatmul.msk.bf16.vlgmr.msra.gmra.mxu3 %vm1550_vm1, %v1536_v33 }
 0x471   : > { %2974 = vrcp.f32 %v1484_v39 }
 0x474   : > { %v1936_v62 = vpop.permute.xlu0 %1935 }
 0x475   : > { %2829 = vmatmul.msk.bf16.vlgmr.msrb.gmra.mxu0 %vm398_vm0, %v1936_v62 }
 0x476   : > { %v2973_v44 = vpop.eup %2972 }
 0x477   : > { %v2975_v28 = vpop.eup %2974  ;;  %v1527_v31 = vmul.f32 %v2973_v44, %v3676_v35  ;;  %v1910_v47 = vpop.permute.xlu2 %1909 }
 0x478   : > { %v1915_v24 = vsel %vm926_vm14, %v1910_v47, 0  ;;  %v1524_v46 = vmul.f32 %v2975_v28, %v3670_v18 }
 0x479   : > { %v1543_v41 = vpack.c.bf16 %v1527_v31, %v1527_v31  ;;  %1924 = vmatpush.bf16.msra.mxu3 %v1915_v24 }
 0x47a   : > { %v1540_v49 = vpack.c.bf16 %v1524_v46, %v1524_v46 }
 0x47b   : > { %2827 = vmatmul.msk.bf16.vlgmr.msra.gmra.mxu2 %vm1550_vm1, %v1543_v41 }
 0x47f   : > { %v1990_v35 = vpop.permute.xlu2 %1989 }
 0x480   : > { %2824 = vmatmul.msk.bf16.vlgmr.msrb.gmra.mxu3 %vm1550_vm1, %v1540_v49 }
 0x481   : > { %2031 = vmatpush.bf16.xpose.msrb.mxu3 %v2022_v50 }
 0x484   : > { %v1963_v51 = vpop.permute.xlu1 %1962 }
 0x485   : > { %2830 = vmatmul.msk.bf16.vlgmr.msrb.gmra.mxu1 %vm398_vm0, %v1963_v51 }
 0x48b   : > { %2831 = vmatmul.msk.bf16.vlgmr.msrb.gmra.mxu2 %vm398_vm0, %v1990_v35 }
 0x48c   : > { %v2017_v53 = vpop.permute.xlu1 %2016 }
 0x49a   : > { %v1566_v11 = vpop.f32.mrf.mxu0 }
 0x49f   : > { %v1496_v56 = vpop.xlane.xlu0 %1495 }
 0x4a0   : > { %2976 = vrcp.f32 %v1496_v56 }
 0x4a2   : > { %v1568_v16 = vpop.f32.mrf.mxu0  ;;  %v1590_v18 = vpop.f32.mrf.mxu1 }
 0x4a6   : > { %v2977_v55 = vpop.eup %2976 }
 0x4a7   : > { %v1528_v45 = vmul.f32 %v2977_v55, %v3725_v10 }
 0x4a9   : > { %v1544_v32 = vpack.c.bf16 %v1528_v45, %v1528_v45  ;;  %v1614_v60 = vpop.f32.mrf.mxu2 }
 0x4aa   : > { %v2135_v30 = vrot.slane %v1614_v60, 4  ;;  %v1592_v20 = vpop.f32.mrf.mxu1  ;;  %v1662_v0 = vpop.f32.mrf.mxu0 }
 0x4ab   : > { %2828 = vmatmul.msk.bf16.vlgmr.msra.gmra.mxu3 %vm1550_vm1, %v1544_v32 }
 0x4ac   : > { %v2136_v23 = vsel %vm609_vm13, %v2135_v30, %v1566_v11 }
 0x4ad   : > { %v2140_v54 = vperm.slane %v2136_v23, %v3241_v58 }
 0x4af   : > { %v2161_v61 = vrot.slane %v2140_v54, 4 }
 0x4b1   : > { %v1616_v27 = vpop.f32.mrf.mxu2  ;;  %v1638_v4 = vpop.f32.mrf.mxu3 }
 0x4b2   : > { %v2141_v37 = vrot.slane %v1638_v4, 4  ;;  %v1664_v36 = vpop.f32.mrf.mxu0  ;;  %v1686_v1 = vpop.f32.mrf.mxu1 }
 0x4b4   : > { %v2142_v5 = vsel %vm609_vm13, %v2141_v37, %v1590_v18 }
 0x4b5   : > { %v2146_v10 = vperm.slane %v2142_v5, %v3241_v58 }
 0x4b7   : > { %v2159_v8 = vrot.slane %v2146_v10, 4  ;;  %v2162_v19 = vsel %vm609_vm13, %v2146_v10, %v2161_v61 }
 0x4b8   : > { %v2170_v47 = vperm.slane %v2162_v19, %v3260_v6 }
 0x4b9   : > { %v1640_v15 = vpop.f32.mrf.mxu3  ;;  %v1710_v48 = vpop.f32.mrf.mxu2  ;;  %v2160_v9 = vsel %vm609_vm13, %v2159_v8, %v2140_v54 }
 0x4ba   : > { %v2147_v26 = vrot.slane %v1710_v48, 4  ;;  %v1688_v29 = vpop.f32.mrf.mxu1  ;;  %v2166_v46 = vperm.slane %v2160_v9, %v3260_v6  ;;  %v2189_v11 = vrot.slane %v2170_v47, 4 }
 0x4bb   : > { %2832 = vmatmul.msk.bf16.vlgmr.msrb.gmra.mxu3 %vm398_vm0, %v2017_v53 }
 0x4bc   : > { %v2148_v59 = vsel %vm609_vm13, %v2147_v26, %v1662_v0  ;;  %v2185_v45 = vrot.slane %v2166_v46, 4 }
 0x4bd   : > { %v2152_v57 = vperm.slane %v2148_v59, %v3241_v58 }
 0x4bf   : > { %v2173_v24 = vrot.slane %v2152_v57, 4 }
 0x4c1   : > { %v1712_v7 = vpop.f32.mrf.mxu2 }
 0x4c2   : > { %v1758_v12 = vpop.f32.mrf.mxu0 }
 0x4ca   : > { %v1760_v22 = vpop.f32.mrf.mxu0  ;;  %v1782_v2 = vpop.f32.mrf.mxu1 }
 0x4d2   : > { %v1784_v40 = vpop.f32.mrf.mxu1 }
 0x4d8   : > { %v1806_v38 = vpop.f32.mrf.mxu2 }
 0x4d9   : > { %v2191_v21 = vrot.slane %v1806_v38, 4 }
 0x4db   : > { %v2192_v3 = vsel %vm609_vm13, %v2191_v21, %v1758_v12 }
 0x4dc   : > { %v2196_v36 = vperm.slane %v2192_v3, %v3241_v58 }
 0x4de   : > { %v2217_v19 = vrot.slane %v2196_v36, 4 }
 0x4e0   : > { %v1808_v34 = vpop.f32.mrf.mxu2 }
 0x4e2   : > { %v1854_v25 = vpop.f32.mrf.mxu0 }
 0x4ea   : > { %v1856_v42 = vpop.f32.mrf.mxu0  ;;  %v1878_v43 = vpop.f32.mrf.mxu1 }
 0x4f2   : > { %v1880_v33 = vpop.f32.mrf.mxu1  ;;  %v3781_v39 = vpop.f32.mrf.mxu0 }
 0x4f3   : > { %v1734_v62 = vpop.f32.mrf.mxu3  ;;  %v2039_v44 = vsel %vm2038_vm2, %v3781_v39, -inf }
 0x4f4   : > { %v2153_v28 = vrot.slane %v1734_v62, 4  ;;  %2040 = vmax.xlane.f32.xlu2 %v2039_v44 }
 0x4f6   : > { %v2154_v31 = vsel %vm609_vm13, %v2153_v28, %v1686_v1 }
 0x4f7   : > { %v2158_v41 = vperm.slane %v2154_v31, %v3241_v58 }
 0x4f9   : > { %v2171_v49 = vrot.slane %v2158_v41, 4  ;;  %v2174_v50 = vsel %vm609_vm13, %v2158_v41, %v2173_v24 }
 0x4fa   : > { %v3791_v51 = vpop.f32.mrf.mxu0  ;;  %v2182_v35 = vperm.slane %v2174_v50, %v3260_v6 }
 0x4fb   : > { %v1736_v56 = vpop.f32.mrf.mxu3  ;;  %v2042_v16 = vsel %vm2038_vm2, %v3791_v51, -inf  ;;  %v2172_v18 = vsel %vm609_vm13, %v2171_v49, %v2152_v57 }
 0x4fc   : > { %2043 = vmax.xlane.f32.xlu1 %v2042_v16  ;;  %v2178_v55 = vperm.slane %v2172_v18, %v3260_v6  ;;  %v2187_v32 = vrot.slane %v2182_v35, 4  ;;  %v3799_v60 = vsel %vm609_vm13, %v2182_v35, %v2189_v11 }
 0x4fe   : > { %v1902_v30 = vpop.f32.mrf.mxu2  ;;  %v2183_v20 = vrot.slane %v2178_v55, 4  ;;  %v3802_v0 = vsel %vm609_vm13, %v2178_v55, %v2185_v45  ;;  %v3805_v23 = vsel %vm609_vm13, %v2187_v32, %v2170_v47 }
 0x4ff   : > { %v2203_v54 = vrot.slane %v1902_v30, 4 }
 0x500   : > { %v3808_v27 = vsel %vm609_vm13, %v2183_v20, %v2166_v46 }
 0x501   : > { %v2204_v4 = vsel %vm609_vm13, %v2203_v54, %v1854_v25 }
 0x502   : > { %v3811_v37 = vpop.f32.mrf.mxu1  ;;  %v2208_v40 = vperm.slane %v2204_v4, %v3241_v58 }
 0x503   : > { %v1830_v1 = vpop.f32.mrf.mxu3  ;;  %v2045_v5 = vsel %vm2038_vm2, %v3811_v37, -inf }
 0x504   : > { %v2197_v61 = vrot.slane %v1830_v1, 4  ;;  %2046 = vmax.xlane.f32.xlu0 %v2045_v5  ;;  %v2229_v25 = vrot.slane %v2208_v40, 4 }
 0x506   : > { %v2198_v10 = vsel %vm609_vm13, %v2197_v61, %v1782_v2  ;;  %v1904_v8 = vpop.f32.mrf.mxu2 }
 0x507   : > { %v2202_v15 = vperm.slane %v2198_v10, %v3241_v58 }
 0x509   : > { %v2215_v48 = vrot.slane %v2202_v15, 4  ;;  %v2218_v9 = vsel %vm609_vm13, %v2202_v15, %v2217_v19 }
 0x50a   : > { %v1981_v53 = vpop.f32.mrf.mxu1  ;;  %v2226_v34 = vperm.slane %v2218_v9, %v3260_v6 }
 0x50b   : > { %v1832_v26 = vpop.f32.mrf.mxu3  ;;  %v2048_v29 = vsel %vm2038_vm2, %v1981_v53, -inf  ;;  %v2216_v59 = vsel %vm609_vm13, %v2215_v48, %v2196_v36 }
 0x50c   : > { %2049 = vmax.xlane.f32.xlu0 %v2048_v29  ;;  %v2222_v33 = vperm.slane %v2216_v59, %v3260_v6  ;;  %v2245_v28 = vrot.slane %v2226_v34, 4 }
 0x50e   : > { %v2006_v7 = vpop.f32.mrf.mxu2  ;;  %v2241_v41 = vrot.slane %v2222_v33, 4 }
 0x50f   : > { %v2051_v12 = vsel %vm2038_vm2, %v2006_v7, -inf }
 0x510   : > { %2052 = vmax.xlane.f32.xlu2 %v2051_v12 }
 0x516   : > { %v3822_v22 = vpop.f32.mrf.mxu2 }
 0x517   : > { %v2054_v2 = vsel %vm2038_vm2, %v3822_v22, -inf }
 0x518   : > { %2055 = vmax.xlane.f32.xlu0 %v2054_v2 }
 0x52e   : > { %v1926_v38 = vpop.f32.mrf.mxu3 }
 0x52f   : > { %v2209_v21 = vrot.slane %v1926_v38, 4 }
 0x531   : > { %v2210_v3 = vsel %vm609_vm13, %v2209_v21, %v1878_v43 }
 0x532   : > { %v2214_v42 = vperm.slane %v2210_v3, %v3241_v58 }
 0x534   : > { %v2227_v57 = vrot.slane %v2214_v42, 4  ;;  %v2230_v62 = vsel %vm609_vm13, %v2214_v42, %v2229_v25 }
 0x535   : > { %v2238_v44 = vperm.slane %v2230_v62, %v3260_v6 }
 0x536   : > { %v1928_v31 = vpop.f32.mrf.mxu3  ;;  %v2228_v47 = vsel %vm609_vm13, %v2227_v57, %v2208_v40 }
 0x537   : > { %v2234_v24 = vperm.slane %v2228_v47, %v3260_v6  ;;  %v2243_v43 = vrot.slane %v2238_v44, 4  ;;  %v3836_v46 = vsel %vm609_vm13, %v2238_v44, %v2245_v28 }
 0x539   : > { %v2239_v49 = vrot.slane %v2234_v24, 4  ;;  %v3839_v58 = vsel %vm609_vm13, %v2234_v24, %v2241_v41  ;;  %v3842_v50 = vsel %vm609_vm13, %v2243_v43, %v2226_v34 }
 0x53b   : > { %v3845_v35 = vsel %vm609_vm13, %v2239_v49, %v2222_v33 }
 0x53e   : > { %v2033_v11 = vpop.f32.mrf.mxu3 }
 0x53f   : > { %v2057_v56 = vsel %vm2038_vm2, %v2033_v11, -inf }
 0x540   : > { %2058 = vmax.xlane.f32.xlu1 %v2057_v56 }
 0x546   : > { %v2035_v6 = vpop.f32.mrf.mxu3 }
 0x547   : > { %v2060_v16 = vsel %vm2038_vm2, %v2035_v6, -inf }
 0x548   : > { %2061 = vmax.xlane.f32.xlu2 %v2060_v16 }
 0x560   : > { %2252 = vrot.lane.b32.xlu2 %v3682_v52, %s3046_s20 }
 0x567   : > { %v2041_v18 = vpop.xlane.xlu2 %2040 }
 0x568   : > { %v2063_v55 = vsub.f32 %v3781_v39, %v2041_v18 }
 0x56a   : > { %v2071_v45 = vmul.f32 1.442695, %v2063_v55 }
 0x56c   : > { %2978 = vpow2.f32 %v2071_v45 }
 0x56f   : > { %v2044_v32 = vpop.xlane.xlu1 %2043 }
 0x570   : > { %v2064_v30 = vsub.f32 %v3791_v51, %v2044_v32 }
 0x572   : > { %v2979_v20 = vpop.eup %2978  ;;  %v2073_v54 = vmul.f32 1.442695, %v2064_v30 }
 0x573   : > { %v2087_v4 = vsel %vm2038_vm2, %v2979_v20, 0.0 }
 0x574   : > { %2980 = vpow2.f32 %v2073_v54  ;;  %2088 = vadd.xlane.f32.xlu0 %v2087_v4 }
 0x577   : > { %v2047_v36 = vpop.xlane.xlu0 %2046 }
 0x578   : > { %v2065_v1 = vsub.f32 %v3811_v37, %v2047_v36 }
 0x57a   : > { %v2981_v5 = vpop.eup %2980  ;;  %v2075_v61 = vmul.f32 1.442695, %v2065_v1 }
 0x57b   : > { %v2090_v52 = vsel %vm2038_vm2, %v2981_v5, 0.0 }
 0x57c   : > { %2982 = vpow2.f32 %v2075_v61  ;;  %2091 = vadd.xlane.f32.xlu1 %v2090_v52 }
 0x57f   : > { %v2050_v39 = vpop.xlane.xlu0 %2049 }
 0x580   : > { %v2066_v10 = vsub.f32 %v1981_v53, %v2050_v39 }
 0x582   : > { %v2983_v8 = vpop.eup %2982  ;;  %v2077_v19 = vmul.f32 1.442695, %v2066_v10 }
 0x583   : > { %v2053_v51 = vpop.xlane.xlu2 %2052  ;;  %v2093_v15 = vsel %vm2038_vm2, %v2983_v8, 0.0 }
 0x584   : > { %2984 = vpow2.f32 %v2077_v19  ;;  %v2067_v48 = vsub.f32 %v2006_v7, %v2053_v51  ;;  %2094 = vadd.xlane.f32.xlu0 %v2093_v15 }
 0x586   : > { %v2079_v9 = vmul.f32 1.442695, %v2067_v48 }
 0x588   : > { %2986 = vpow2.f32 %v2079_v9 }
 0x58a   : > { %v2985_v26 = vpop.eup %2984 }
 0x58b   : > { %v2096_v37 = vsel %vm2038_vm2, %v2985_v26, 0.0  ;;  %v2056_v2 = vpop.xlane.xlu0 %2055 }
 0x58c   : > { %2097 = vadd.xlane.f32.xlu1 %v2096_v37  ;;  %v2068_v21 = vsub.f32 %v3822_v22, %v2056_v2 }
 0x58e   : > { %v3858_v29 = vpop.eup %2986 }
 0x58f   : > { %v2099_v59 = vsel %vm2038_vm2, %v3858_v29, 0.0 }
 0x590   : > { %2100 = vadd.xlane.f32.xlu0 %v2099_v59 }
 0x5a4   : > { %2277 = vrot.lane.b32.xlu0 %v3692_v63, %s3046_s20  ;;  %v2081_v63 = vmul.f32 1.442695, %v2068_v21 }
 0x5a5   : > { %2302 = vrot.lane.b32.xlu1 %v3709_v17, %s3046_s20 }
 0x5b3   : > { %v2059_v53 = vpop.xlane.xlu1 %2058 }
 0x5b4   : > { %v2069_v7 = vsub.f32 %v2033_v11, %v2059_v53 }
 0x5b6   : > { %v2083_v12 = vmul.f32 1.442695, %v2069_v7 }
 0x5b8   : > { %2988 = vpow2.f32 %v2083_v12 }
 0x5bb   : > { %v2062_v40 = vpop.xlane.xlu2 %2061 }
 0x5bc   : > { %v2070_v38 = vsub.f32 %v2035_v6, %v2062_v40 }
 0x5be   : > { %v3867_v3 = vpop.eup %2988  ;;  %v2085_v25 = vmul.f32 1.442695, %v2070_v38 }
 0x5bf   : > { %v2105_v34 = vsel %vm2038_vm2, %v3867_v3, 0.0 }
 0x5c0   : > { %2106 = vadd.xlane.f32.xlu2 %v2105_v34  ;;  %2990 = vpow2.f32 %v2085_v25 }
 0x5c1   : > { %2992 = vpow2.f32 %v2081_v63 }
 0x5c3   : > { %v2253_v42 = vpop.permute.xlu2 %2252 }
 0x5c4   : > { %2265 = vmatpush.bf16.msra.mxu0 %v2253_v42  ;;  %v3026_v42 = vld [vmem:[%s3123_s22] sm:$0xff] }
 0x5c6   : > { %v2991_v17 = vpop.eup %2990 }
 0x5c7   : > { %v2993_v33 = vpop.eup %2992  ;;  %v2108_v57 = vsel %vm2038_vm2, %v2991_v17, 0.0 }
 0x5c8   : > { %v2102_v62 = vsel %vm2038_vm2, %v2993_v33, 0.0 }
 0x5ce   : > { %2109 = vadd.xlane.f32.xlu0 %v2108_v57 }
 0x5cf   : > { %2103 = vadd.xlane.f32.xlu1 %v2102_v62  ;;  %v3027_v62 = vld [vmem:[%s3123_s22 + $0x8] sm:$0xff] }
 0x5e7   : > { %v2089_v22 = vpop.xlane.xlu0 %2088 }
 0x5e8   : > { %2327 = vrot.lane.b32.xlu1 %v3703_v13, %s3046_s20  ;;  %2994 = vrcp.f32 %v2089_v22 }
 0x5ee   : > { %v2995_v28 = vpop.eup %2994 }
 0x5ef   : > { %v2092_v44 = vpop.xlane.xlu1 %2091  ;;  %v2119_v31 = vmul.f32 %v2995_v28, %v2979_v20 }
 0x5f0   : > { %2996 = vrcp.f32 %v2092_v44 }
 0x5f1   : > { %v2127_v24 = vpack.c.bf16 %v2119_v31, %v2119_v31  ;;  %v3028_v31 = vld [vmem:[%s3123_s22 + $0x10] sm:$0xff] }
 0x5f3   : > { %v2249_v49 = vunpack.c.l.b16 %v2127_v24 }
 0x5f6   : > { %v2997_v47 = vpop.eup %2996 }
 0x5f7   : > { %v2120_v41 = vmul.f32 %v2997_v47, %v2981_v5  ;;  %v2095_v16 = vpop.xlane.xlu0 %2094 }
 0x5f9   : > { %v2128_v43 = vpack.c.bf16 %v2120_v41, %v2120_v41 }
 0x5fb   : > { %v2250_v11 = vunpack.c.l.b16 %v2128_v43  ;;  %v3029_v43 = vld [vmem:[%s3123_s22 + $0x18] sm:$0xff] }
 0x5fd   : > { %v2251_v56 = vpack.c.b16 %v2250_v11, %v2249_v49 }
 0x5ff   : > { %2833 = vmatmul.msk.bf16.vlgmr.msra.gmra.mxu0 %vm2038_vm2, %v2251_v56  ;;  %v2098_v6 = vpop.xlane.xlu1 %2097 }
 0x600   : > { %2998 = vrcp.f32 %v2098_v6  ;;  %v3030_v6 = vld [vmem:[%s3123_s22 + $0x20] sm:$0xff] }
 0x601   : > { %3000 = vrcp.f32 %v2095_v16 }
 0x603   : > { %v2101_v32 = vpop.xlane.xlu0 %2100 }
 0x604   : > { %3002 = vrcp.f32 %v2101_v32 }
 0x606   : > { %v2999_v18 = vpop.eup %2998 }
 0x607   : > { %v3001_v13 = vpop.eup %3000  ;;  %v2122_v55 = vmul.f32 %v2999_v18, %v2985_v26 }
 0x608   : > { %v2121_v45 = vmul.f32 %v3001_v13, %v2983_v8 }
 0x609   : > { %v2130_v30 = vpack.c.bf16 %v2122_v55, %v2122_v55  ;;  %v3031_v55 = vld [vmem:[%s3123_s22 + $0x28] sm:$0xff] }
 0x60a   : > { %v2129_v20 = vpack.c.bf16 %v2121_v45, %v2121_v45  ;;  %v3003_v52 = vpop.eup %3002 }
 0x60b   : > { %v2275_v54 = vunpack.c.l.b16 %v2130_v30  ;;  %v2123_v10 = vmul.f32 %v3003_v52, %v3858_v29 }
 0x60c   : > { %v2274_v4 = vunpack.c.l.b16 %v2129_v20 }
 0x60d   : > { %v2131_v51 = vpack.c.bf16 %v2123_v10, %v2123_v10 }
 0x60e   : > { %v2276_v5 = vpack.c.b16 %v2275_v54, %v2274_v4 }
 0x60f   : > { %v2299_v26 = vunpack.c.l.b16 %v2131_v51 }
 0x616   : > { %v2278_v36 = vpop.permute.xlu0 %2277 }
 0x617   : > { %2290 = vmatpush.bf16.msra.mxu1 %v2278_v36  ;;  %v2303_v1 = vpop.permute.xlu1 %2302 }
 0x618   : > { %2315 = vmatpush.bf16.msra.mxu2 %v2303_v1 }
 0x61a   : > { %2834 = vmatmul.msk.bf16.vlgmr.msra.gmra.mxu1 %vm2038_vm2, %v2276_v5 }
 0x633   : > { %v2107_v8 = vpop.xlane.xlu2 %2106 }
 0x641   : > { %v2110_v39 = vpop.xlane.xlu0 %2109 }
 0x642   : > { %v2104_v61 = vpop.xlane.xlu1 %2103 }
 0x643   : > { %3004 = vrcp.f32 %v2104_v61 }
 0x644   : > { %3006 = vrcp.f32 %v2110_v39 }
 0x645   : > { %3008 = vrcp.f32 %v2107_v8  ;;  %v3033_v8 = vld [vmem:[%s3123_s22 + $0x38] sm:$0xff] }
 0x649   : > { %v3005_v19 = vpop.eup %3004 }
 0x64a   : > { %v2124_v15 = vmul.f32 %v3005_v19, %v2993_v33  ;;  %v3007_v9 = vpop.eup %3006 }
 0x64b   : > { %v3009_v59 = vpop.eup %3008  ;;  %v2126_v53 = vmul.f32 %v3007_v9, %v2991_v17 }
 0x64c   : > { %v2132_v48 = vpack.c.bf16 %v2124_v15, %v2124_v15  ;;  %v2125_v12 = vmul.f32 %v3009_v59, %v3867_v3 }
 0x64d   : > { %v2134_v2 = vpack.c.bf16 %v2126_v53, %v2126_v53 }
 0x64e   : > { %v2300_v37 = vunpack.c.l.b16 %v2132_v48  ;;  %v2133_v29 = vpack.c.bf16 %v2125_v12, %v2125_v12 }
 0x64f   : > { %v2325_v40 = vunpack.c.l.b16 %v2134_v2 }
 0x650   : > { %v2301_v7 = vpack.c.b16 %v2300_v37, %v2299_v26  ;;  %v2324_v38 = vunpack.c.l.b16 %v2133_v29 }
 0x652   : > { %2835 = vmatmul.msk.bf16.vlgmr.msra.gmra.mxu2 %vm2038_vm2, %v2301_v7  ;;  %v2326_v34 = vpack.c.b16 %v2325_v40, %v2324_v38 }
 0x65a   : > { %v2328_v21 = vpop.permute.xlu1 %2327 }
 0x65b   : > { %2340 = vmatpush.bf16.msra.mxu3 %v2328_v21 }
 0x65e   : > { %2836 = vmatmul.msk.bf16.vlgmr.msra.gmra.mxu3 %vm2038_vm2, %v2326_v34 }
 0x67c   : > { %v2267_v25 = vpop.f32.mrf.mxu0 }
 0x67d   : > { %v2268_v63 = vadd.f32 %v2267_v25, %v3808_v27 }
 0x67f   : > { %v3883_v17 = vadd.f32 %v3026_v42, %v2268_v63 }
 0x681   : > { %v2357_v3 = vsel %vm398_vm0, %v3883_v17, 0.0 }
 0x682   : > { %2358 = vadd.xlane.f32.xlu1 %v2357_v3 }
 0x684   : > { %v2269_v33 = vpop.f32.mrf.mxu0 }
 0x685   : > { %v2270_v57 = vadd.f32 %v2269_v33, %v3845_v35 }
 0x687   : > { %v3889_v22 = vadd.f32 %v3027_v62, %v2270_v57 }
 0x689   : > { %v2360_v44 = vsel %vm398_vm0, %v3889_v22, 0.0 }
 0x68a   : > { %2361 = vadd.xlane.f32.xlu2 %v2360_v44 }
 0x697   : > { %v2292_v27 = vpop.f32.mrf.mxu1 }
 0x698   : > { %v2293_v28 = vadd.f32 %v2292_v27, %v3802_v0 }
 0x69a   : > { %v3895_v47 = vadd.f32 %v3028_v31, %v2293_v28 }
 0x69c   : > { %v2363_v24 = vsel %vm398_vm0, %v3895_v47, 0.0 }
 0x69d   : > { %2364 = vadd.xlane.f32.xlu2 %v2363_v24 }
 0x69f   : > { %v2294_v35 = vpop.f32.mrf.mxu1 }
 0x6a0   : > { %v2295_v41 = vadd.f32 %v2294_v35, %v3839_v58 }
 0x6a2   : > { %v3901_v49 = vadd.f32 %v3029_v43, %v2295_v41  ;;  %v2870_v43 = vld [vmem:[%s4084_s7 + $0x8] sm:$0xff] }
 0x6a3   : > { %2597 = vmatpush.bf16.msrb.mxu0 %v2870_v43 }
 0x6a4   : > { %v2366_v11 = vsel %vm398_vm0, %v3901_v49, 0.0 }
 0x6a5   : > { %2367 = vadd.xlane.f32.xlu0 %v2366_v11 }
 0x6d5   : > { %v2317_v0 = vpop.f32.mrf.mxu2 }
 0x6d6   : > { %v2318_v56 = vadd.f32 %v2317_v0, %v3805_v23  ;;  %v3032_v23 = vld [vmem:[%s3123_s22 + $0x30] sm:$0xff]  ;;  %v2869_v0 = vld [vmem:[%s4084_s7] sm:$0xff] }
 0x6d7   : > { %2598 = vmatpush.bf16.msrb.mxu0 %v2869_v0 }
 0x6d8   : > { %v3907_v16 = vadd.f32 %v3030_v6, %v2318_v56 }
 0x6da   : > { %v2369_v18 = vsel %vm398_vm0, %v3907_v16, 0.0 }
 0x6db   : > { %2370 = vadd.xlane.f32.xlu2 %v2369_v18 }
 0x6dd   : > { %v2319_v13 = vpop.f32.mrf.mxu2 }
 0x6de   : > { %v2320_v58 = vadd.f32 %v2319_v13, %v3842_v50 }
 0x6e0   : > { %v3913_v45 = vadd.f32 %v3031_v55, %v2320_v58 }
 0x6e1   : > { %v2342_v32 = vpop.f32.mrf.mxu3 }
 0x6e2   : > { %v2343_v30 = vadd.f32 %v2342_v32, %v3799_v60  ;;  %v2372_v20 = vsel %vm398_vm0, %v3913_v45, 0.0 }
 0x6e3   : > { %2373 = vadd.xlane.f32.xlu0 %v2372_v20 }
 0x6e4   : > { %v3919_v54 = vadd.f32 %v3032_v23, %v2343_v30 }
 0x6e6   : > { %v2375_v4 = vsel %vm398_vm0, %v3919_v54, 0.0 }
 0x6e9   : > { %v2344_v5 = vpop.f32.mrf.mxu3 }
 0x6ea   : > { %v2345_v61 = vadd.f32 %v2344_v5, %v3836_v46 }
 0x6eb   : > { %2376 = vadd.xlane.f32.xlu0 %v2375_v4 }
 0x6ec   : > { %v3933_v19 = vadd.f32 %v3033_v8, %v2345_v61 }
 0x6ee   : > { %v2378_v48 = vsel %vm398_vm0, %v3933_v19, 0.0 }
 0x6f5   : > { %v2359_v36 = vpop.xlane.xlu1 %2358 }
 0x6f6   : > { %v2381_v50 = vmul.f32 %v2359_v36, %v3133_v14 }
 0x6f8   : > { %v3925_v1 = vsub.f32 %v3883_v17, %v2381_v50 }
 0x6fa   : > { %v2397_v60 = vmul.f32 %v3925_v1, %v3925_v1 }
 0x6fc   : > { %v2405_v52 = vsel %vm398_vm0, %v2397_v60, 0.0 }
 0x6fd   : > { %2406 = vadd.xlane.f32.xlu2 %v2405_v52  ;;  %v2362_v39 = vpop.xlane.xlu2 %2361 }
 0x6fe   : > { %v2382_v10 = vmul.f32 %v2362_v39, %v3133_v14 }
 0x700   : > { %v3936_v51 = vsub.f32 %v3889_v22, %v2382_v10 }
 0x702   : > { %v2398_v15 = vmul.f32 %v3936_v51, %v3936_v51 }
 0x704   : > { %v2408_v46 = vsel %vm398_vm0, %v2398_v15, 0.0  ;;  %v3996_v15 = vld [vmem:[%s4082_s5] ss:$0 sm:$0xff] }
 0x705   : > { %2379 = vadd.xlane.f32.xlu2 %v2378_v48  ;;  %2409 = vadd.xlane.f32.xlu1 %v2408_v46 }
 0x710   : > { %v2365_v9 = vpop.xlane.xlu2 %2364 }
 0x711   : > { %v2383_v26 = vmul.f32 %v2365_v9, %v3133_v14 }
 0x713   : > { %v3945_v37 = vsub.f32 %v3895_v47, %v2383_v26 }
 0x715   : > { %v2399_v59 = vmul.f32 %v3945_v37, %v3945_v37 }
 0x717   : > { %v2411_v53 = vsel %vm398_vm0, %v2399_v59, 0.0 }
 0x718   : > { %v2368_v7 = vpop.xlane.xlu0 %2367  ;;  %2412 = vadd.xlane.f32.xlu1 %v2411_v53 }
 0x719   : > { %v2384_v12 = vmul.f32 %v2368_v7, %v3133_v14  ;;  %v4003_v7 = vld [vmem:[%s4083_s6] ss:$0 sm:$0xff] }
 0x71b   : > { %v3952_v2 = vsub.f32 %v3901_v49, %v2384_v12 }
 0x71d   : > { %v2400_v29 = vmul.f32 %v3952_v2, %v3952_v2 }
 0x71f   : > { %v2414_v40 = vsel %vm398_vm0, %v2400_v29, 0.0 }
 0x720   : > { %2415 = vadd.xlane.f32.xlu0 %v2414_v40 }
 0x74e   : > { %v2371_v38 = vpop.xlane.xlu2 %2370 }
 0x74f   : > { %v2385_v21 = vmul.f32 %v2371_v38, %v3133_v14 }
 0x751   : > { %v3959_v34 = vsub.f32 %v3907_v16, %v2385_v21 }
 0x753   : > { %v2401_v25 = vmul.f32 %v3959_v34, %v3959_v34 }
 0x755   : > { %v2417_v63 = vsel %vm398_vm0, %v2401_v25, 0.0 }
 0x756   : > { %v2374_v42 = vpop.xlane.xlu0 %2373  ;;  %2418 = vadd.xlane.f32.xlu2 %v2417_v63 }
 0x757   : > { %v2386_v3 = vmul.f32 %v2374_v42, %v3133_v14 }
 0x759   : > { %v3966_v33 = vsub.f32 %v3913_v45, %v2386_v3 }
 0x75b   : > { %v2402_v57 = vmul.f32 %v3966_v33, %v3966_v33 }
 0x75d   : > { %v2420_v62 = vsel %vm398_vm0, %v2402_v57, 0.0 }
 0x75e   : > { %v2377_v44 = vpop.xlane.xlu0 %2376  ;;  %2421 = vadd.xlane.f32.xlu1 %v2420_v62 }
 0x75f   : > { %v2387_v27 = vmul.f32 %v2377_v44, %v3133_v14 }
 0x761   : > { %v3973_v28 = vsub.f32 %v3919_v54, %v2387_v27 }
 0x763   : > { %v2403_v31 = vmul.f32 %v3973_v28, %v3973_v28 }
 0x765   : > { %v2423_v24 = vsel %vm398_vm0, %v2403_v31, 0.0 }
 0x766   : > { %2424 = vadd.xlane.f32.xlu0 %v2423_v24 }
 0x770   : > { %v2407_v35 = vpop.xlane.xlu2 %2406 }
 0x771   : > { %v2429_v41 = vmul.f32 %v2407_v35, %v3133_v14 }
 0x773   : > { %v2437_v11 = vadd.f32 1e-05, %v2429_v41 }
 0x775   : > { %3010 = vrsqrt.f32 %v2437_v11  ;;  %vm2451_vm3 = vweird.f32 %v2437_v11 }
 0x778   : > { %v2410_v56 = vpop.xlane.xlu1 %2409  ;;  %v2380_v6 = vpop.xlane.xlu2 %2379 }
 0x779   : > { %v2430_v18 = vmul.f32 %v2410_v56, %v3133_v14  ;;  %v2388_v13 = vmul.f32 %v2380_v6, %v3133_v14 }
 0x77b   : > { %v3011_v58 = vpop.eup %3010  ;;  %v2438_v55 = vadd.f32 1e-05, %v2430_v18  ;;  %v3988_v32 = vsub.f32 %v3933_v19, %v2388_v13 }
 0x77c   : > { %v2446_v30 = vmul.f32 %v3011_v58, %v2437_v11  ;;  %vm2452_vm13 = vweird.f32 %v3011_v58 }
 0x77d   : > { %3012 = vrsqrt.f32 %v2438_v55  ;;  %v2404_v20 = vmul.f32 %v3988_v32, %v3988_v32  ;;  %vm2453_vm4 = vmor %vm2451_vm3, %vm2452_vm13  ;;  %vm2461_vm6 = vweird.f32 %v2438_v55 }
 0x77e   : > { %v2447_v23 = vmul.f32 %v3011_v58, %v2446_v30 }
 0x77f   : > { %v2426_v4 = vsel %vm398_vm0, %v2404_v20, 0.0 }
 0x780   : > { %v2448_v36 = vmul.f32 0.5, %v2447_v23  ;;  %2427 = vadd.xlane.f32.xlu2 %v2426_v4 }
 0x782   : > { %v2449_v50 = vsub.f32 1.5, %v2448_v36 }
 0x783   : > { %v3013_v5 = vpop.eup %3012 }
 0x784   : > { %v2450_v60 = vmul.f32 %v3011_v58, %v2449_v50  ;;  %v2456_v61 = vmul.f32 %v3013_v5, %v2438_v55  ;;  %vm2462_vm5 = vweird.f32 %v3013_v5 }
 0x785   : > { %vm2463_vm7 = vmor %vm2461_vm6, %vm2462_vm5 }
 0x786   : > { %v2457_v52 = vmul.f32 %v3013_v5, %v2456_v61  ;;  %v2454_v39 = vsel %vm2453_vm4, %v3011_v58, %v2450_v60 }
 0x787   : > { %v2525_v48 = vmul.f32 %v2454_v39, %v3925_v1 }
 0x788   : > { %v2458_v10 = vmul.f32 0.5, %v2457_v52 }
 0x789   : > { %v2536_v12 = vmul.f32 %v3996_v15, %v2525_v48 }
 0x78a   : > { %v2459_v8 = vsub.f32 1.5, %v2458_v10 }
 0x78b   : > { %v2413_v46 = vpop.xlane.xlu1 %2412  ;;  %v2547_v40 = vadd.f32 %v4003_v7, %v2536_v12 }
 0x78c   : > { %v2460_v9 = vmul.f32 %v3013_v5, %v2459_v8  ;;  %v2431_v26 = vmul.f32 %v2413_v46, %v3133_v14 }
 0x78e   : > { %v2464_v59 = vsel %vm2463_vm7, %v3013_v5, %v2460_v9  ;;  %v2439_v53 = vadd.f32 1e-05, %v2431_v26 }
 0x78f   : > { %v2526_v29 = vmul.f32 %v2464_v59, %v3936_v51 }
 0x790   : > { %3014 = vrsqrt.f32 %v2439_v53  ;;  %vm2471_vm9 = vweird.f32 %v2439_v53 }
 0x791   : > { %v2537_v1 = vmul.f32 %v3996_v15, %v2526_v29 }
 0x793   : > { %v2548_v38 = vadd.f32 %v4003_v7, %v2537_v1  ;;  %v2416_v21 = vpop.xlane.xlu0 %2415 }
 0x794   : > { %v2432_v25 = vmul.f32 %v2416_v21, %v3133_v14 }
 0x795   : > { %v2555_v63 = vpack.c.bf16 %v2548_v38, %v2547_v40 }
 0x796   : > { %v3015_v42 = vpop.eup %3014  ;;  %v2440_v3 = vadd.f32 1e-05, %v2432_v25 }
 0x797   : > { %v2466_v57 = vmul.f32 %v3015_v42, %v2439_v53  ;;  %2845 = vmatmul.msk.bf16.vlgmr.msrb.gmra.mxu0 %vm398_vm0, %v2555_v63  ;;  %vm2472_vm8 = vweird.f32 %v3015_v42 }
 0x798   : > { %3016 = vrsqrt.f32 %v2440_v3  ;;  %vm2473_vm10 = vmor %vm2471_vm9, %vm2472_vm8  ;;  %vm2481_vm12 = vweird.f32 %v2440_v3 }
 0x799   : > { %v2467_v62 = vmul.f32 %v3015_v42, %v2466_v57 }
 0x79b   : > { %v2468_v44 = vmul.f32 0.5, %v2467_v62 }
 0x79d   : > { %v2469_v51 = vsub.f32 1.5, %v2468_v44 }
 0x79e   : > { %v3017_v27 = vpop.eup %3016 }
 0x79f   : > { %v2470_v31 = vmul.f32 %v3015_v42, %v2469_v51  ;;  %v2476_v24 = vmul.f32 %v3017_v27, %v2440_v3  ;;  %vm2482_vm11 = vweird.f32 %v3017_v27 }
 0x7a0   : > { %vm2483_vm14 = vmor %vm2481_vm12, %vm2482_vm11 }
 0x7a1   : > { %v2477_v35 = vmul.f32 %v3017_v27, %v2476_v24  ;;  %v2474_v41 = vsel %vm2473_vm10, %v3015_v42, %v2470_v31 }
 0x7a2   : > { %v2527_v0 = vmul.f32 %v2474_v41, %v3945_v37  ;;  %v2872_v41 = vld [vmem:[%s4086_s9 + $0x8] sm:$0xff] }
 0x7a3   : > { %v2478_v43 = vmul.f32 0.5, %v2477_v35  ;;  %2670 = vmatpush.bf16.msrb.mxu1 %v2872_v41 }
 0x7a4   : > { %v2538_v13 = vmul.f32 %v3996_v15, %v2527_v0 }
 0x7a5   : > { %v2479_v11 = vsub.f32 1.5, %v2478_v43 }
 0x7a6   : > { %v2549_v55 = vadd.f32 %v4003_v7, %v2538_v13 }
 0x7a7   : > { %v2480_v56 = vmul.f32 %v3017_v27, %v2479_v11 }
 0x7a9   : > { %v2484_v6 = vsel %vm2483_vm14, %v3017_v27, %v2480_v56  ;;  %v2871_v56 = vld [vmem:[%s4086_s9] sm:$0xff] }
 0x7aa   : > { %v2528_v18 = vmul.f32 %v2484_v6, %v3952_v2  ;;  %2671 = vmatpush.bf16.msrb.mxu1 %v2871_v56 }
 0x7ac   : > { %v2539_v58 = vmul.f32 %v3996_v15, %v2528_v18 }
 0x7ae   : > { %v2550_v30 = vadd.f32 %v4003_v7, %v2539_v58 }
 0x7b0   : > { %v2556_v20 = vpack.c.bf16 %v2550_v30, %v2549_v55 }
 0x7b2   : > { %2846 = vmatmul.msk.bf16.gmra.mxu0 %vm398_vm0, %v2556_v20 }
 0x7c9   : > { %v2419_v23 = vpop.xlane.xlu2 %2418 }
 0x7ca   : > { %v2433_v37 = vmul.f32 %v2419_v23, %v3133_v14 }
 0x7cc   : > { %v2441_v4 = vadd.f32 1e-05, %v2433_v37 }
 0x7ce   : > { %3018 = vrsqrt.f32 %v2441_v4  ;;  %vm2491_vm1 = vweird.f32 %v2441_v4 }
 0x7d1   : > { %v2422_v36 = vpop.xlane.xlu1 %2421 }
 0x7d2   : > { %v2434_v50 = vmul.f32 %v2422_v36, %v3133_v14 }
 0x7d4   : > { %v3019_v2 = vpop.eup %3018  ;;  %v2442_v5 = vadd.f32 1e-05, %v2434_v50 }
 0x7d5   : > { %v2486_v60 = vmul.f32 %v3019_v2, %v2441_v4  ;;  %vm2492_vm15 = vweird.f32 %v3019_v2 }
 0x7d6   : > { %3020 = vrsqrt.f32 %v2442_v5  ;;  %vm2493_vm2 = vmor %vm2491_vm1, %vm2492_vm15  ;;  %vm2501_vm3 = vweird.f32 %v2442_v5 }
 0x7d7   : > { %v2487_v61 = vmul.f32 %v3019_v2, %v2486_v60 }
 0x7d9   : > { %v2488_v52 = vmul.f32 0.5, %v2487_v61  ;;  %v2425_v10 = vpop.xlane.xlu0 %2424 }
 0x7da   : > { %v2435_v9 = vmul.f32 %v2425_v10, %v3133_v14 }
 0x7db   : > { %v2489_v39 = vsub.f32 1.5, %v2488_v52 }
 0x7dc   : > { %v3021_v8 = vpop.eup %3020  ;;  %v2443_v12 = vadd.f32 1e-05, %v2435_v9 }
 0x7dd   : > { %v2490_v48 = vmul.f32 %v3019_v2, %v2489_v39  ;;  %v2496_v46 = vmul.f32 %v3021_v8, %v2442_v5  ;;  %vm2502_vm13 = vweird.f32 %v3021_v8 }
 0x7de   : > { %vm2503_vm4 = vmor %vm2501_vm3, %vm2502_vm13  ;;  %3022 = vrsqrt.f32 %v2443_v12  ;;  %vm2511_vm6 = vweird.f32 %v2443_v12 }
 0x7df   : > { %v2497_v26 = vmul.f32 %v3021_v8, %v2496_v46  ;;  %v2494_v59 = vsel %vm2493_vm2, %v3019_v2, %v2490_v48 }
 0x7e0   : > { %v2529_v1 = vmul.f32 %v2494_v59, %v3959_v34 }
 0x7e1   : > { %v2498_v53 = vmul.f32 0.5, %v2497_v26 }
 0x7e2   : > { %v2540_v25 = vmul.f32 %v3996_v15, %v2529_v1 }
 0x7e3   : > { %v2499_v29 = vsub.f32 1.5, %v2498_v53 }
 0x7e4   : > { %v3023_v42 = vpop.eup %3022  ;;  %v2551_v3 = vadd.f32 %v4003_v7, %v2540_v25 }
 0x7e5   : > { %v2500_v40 = vmul.f32 %v3021_v8, %v2499_v29  ;;  %v2506_v44 = vmul.f32 %v3023_v42, %v2443_v12  ;;  %vm2512_vm5 = vweird.f32 %v3023_v42 }
 0x7e6   : > { %vm2513_vm7 = vmor %vm2511_vm6, %vm2512_vm5 }
 0x7e7   : > { %v2504_v38 = vsel %vm2503_vm4, %v3021_v8, %v2500_v40  ;;  %v2507_v34 = vmul.f32 %v3023_v42, %v2506_v44 }
 0x7e8   : > { %v2530_v21 = vmul.f32 %v2504_v38, %v3966_v33 }
 0x7e9   : > { %v2508_v24 = vmul.f32 0.5, %v2507_v34 }
 0x7ea   : > { %v2541_v63 = vmul.f32 %v3996_v15, %v2530_v21 }
 0x7eb   : > { %v2509_v33 = vsub.f32 1.5, %v2508_v24 }
 0x7ec   : > { %v2552_v57 = vadd.f32 %v4003_v7, %v2541_v63 }
 0x7ed   : > { %v2510_v43 = vmul.f32 %v3023_v42, %v2509_v33 }
 0x7ee   : > { %v2557_v62 = vpack.c.bf16 %v2552_v57, %v2551_v3  ;;  %v2895_v57 = vld [vmem:[%s4087_s10] ss:$0 sm:$0xff] }
 0x7f0   : > { %2847 = vmatmul.msk.bf16.gmra.mxu0 %vm398_vm0, %v2557_v62 }
 0x7f3   : > { %v2428_v51 = vpop.xlane.xlu2 %2427 }
 0x7f4   : > { %v2436_v27 = vmul.f32 %v2428_v51, %v3133_v14  ;;  %v2514_v14 = vsel %vm2513_vm7, %v3023_v42, %v2510_v43 }
 0x7f5   : > { %v2531_v13 = vmul.f32 %v2514_v14, %v3973_v28  ;;  %v2894_v28 = vld [vmem:[%s4085_s8] ss:$0 sm:$0xff] }
 0x7f6   : > { %v2444_v31 = vadd.f32 1e-05, %v2436_v27 }
 0x7f7   : > { %v2542_v20 = vmul.f32 %v3996_v15, %v2531_v13 }
 0x7f8   : > { %3024 = vrsqrt.f32 %v2444_v31  ;;  %vm2521_vm9 = vweird.f32 %v2444_v31 }
 0x7f9   : > { %v2553_v37 = vadd.f32 %v4003_v7, %v2542_v20 }
 0x7fe   : > { %v3025_v35 = vpop.eup %3024 }
 0x7ff   : > { %v2516_v11 = vmul.f32 %v3025_v35, %v2444_v31  ;;  %vm2522_vm8 = vweird.f32 %v3025_v35 }
 0x800   : > { %vm2523_vm10 = vmor %vm2521_vm9, %vm2522_vm8 }
 0x801   : > { %v2517_v0 = vmul.f32 %v3025_v35, %v2516_v11 }
 0x803   : > { %v2518_v6 = vmul.f32 0.5, %v2517_v0 }
 0x805   : > { %v2519_v18 = vsub.f32 1.5, %v2518_v6 }
 0x807   : > { %v2520_v58 = vmul.f32 %v3025_v35, %v2519_v18 }
 0x809   : > { %v2524_v55 = vsel %vm2523_vm10, %v3025_v35, %v2520_v58 }
 0x80a   : > { %v2532_v30 = vmul.f32 %v2524_v55, %v3988_v32 }
 0x80c   : > { %v2543_v23 = vmul.f32 %v3996_v15, %v2532_v30 }
 0x80e   : > { %v2554_v4 = vadd.f32 %v4003_v7, %v2543_v23 }
 0x810   : > { %v2558_v36 = vpack.c.bf16 %v2554_v4, %v2553_v37 }
 0x812   : > { %2848 = vmatmul.msk.bf16.gmra.mxu0 %vm398_vm0, %v2558_v36 }
 0x814   : > { %v2600_v50 = vpop.f32.mrf.mxu0 }
 0x815   : > { %v2601_v2 = vadd.f32 %v2894_v28, %v2600_v50 }
 0x817   : > { %v2620_v32 = vmax.f32 %v2601_v2, 0.0 }
 0x81c   : > { %v2602_v5 = vpop.f32.mrf.mxu0 }
 0x81d   : > { %v2603_v60 = vadd.f32 %v2894_v28, %v2602_v5 }
 0x81f   : > { %v2621_v61 = vmax.f32 %v2603_v60, 0.0 }
 0x821   : > { %v2628_v52 = vpack.c.bf16 %v2621_v61, %v2620_v32 }
 0x823   : > { %2857 = vmatmul.msk.bf16.vlgmr.msrb.gmra.mxu1 %vm398_vm0, %v2628_v52 }
 0x82f   : > { %v2605_v15 = vpop.f32.mrf.mxu0 }
 0x830   : > { %v2606_v39 = vadd.f32 %v2894_v28, %v2605_v15 }
 0x832   : > { %v2622_v8 = vmax.f32 %v2606_v39, 0.0 }
 0x837   : > { %v2607_v10 = vpop.f32.mrf.mxu0 }
 0x838   : > { %v2608_v7 = vadd.f32 %v2894_v28, %v2607_v10 }
 0x83a   : > { %v2623_v48 = vmax.f32 %v2608_v7, 0.0 }
 0x83c   : > { %v2629_v46 = vpack.c.bf16 %v2623_v48, %v2622_v8 }
 0x83e   : > { %2858 = vmatmul.msk.bf16.gmra.mxu1 %vm398_vm0, %v2629_v46 }
 0x86d   : > { %v2610_v9 = vpop.f32.mrf.mxu0 }
 0x86e   : > { %v2611_v26 = vadd.f32 %v2894_v28, %v2610_v9 }
 0x870   : > { %v2624_v12 = vmax.f32 %v2611_v26, 0.0 }
 0x875   : > { %v2612_v59 = vpop.f32.mrf.mxu0 }
 0x876   : > { %v2613_v53 = vadd.f32 %v2894_v28, %v2612_v59 }
 0x878   : > { %v2625_v29 = vmax.f32 %v2613_v53, 0.0 }
 0x87a   : > { %v2630_v1 = vpack.c.bf16 %v2625_v29, %v2624_v12 }
 0x87c   : > { %2859 = vmatmul.msk.bf16.gmra.mxu1 %vm398_vm0, %v2630_v1 }
 0x88f   : > { %v2615_v40 = vpop.f32.mrf.mxu0 }
 0x890   : > { %v2616_v38 = vadd.f32 %v2894_v28, %v2615_v40 }
 0x892   : > { %v2626_v63 = vmax.f32 %v2616_v38, 0.0 }
 0x897   : > { %v2617_v21 = vpop.f32.mrf.mxu0 }
 0x898   : > { %v2618_v25 = vadd.f32 %v2894_v28, %v2617_v21 }
 0x89a   : > { %v2627_v42 = vmax.f32 %v2618_v25, 0.0 }
 0x89c   : > { %v2631_v3 = vpack.c.bf16 %v2627_v42, %v2626_v63 }
 0x89e   : > { %2860 = vmatmul.msk.bf16.gmra.mxu1 %vm398_vm0, %v2631_v3 }
 0x8a0   : > { %v2673_v62 = vpop.f32.mrf.mxu1 }
 0x8a1   : > { %v2674_v44 = vadd.f32 %v2895_v57, %v2673_v62 }
 0x8a3   : > { %v2693_v34 = vadd.f32 %v2674_v44, %v3883_v17 }
 0x8a5   : > { %2701 = vst.msk [vmem:[%s386_s23] sm:$0xff] %vm398_vm0, %v2693_v34 }
 0x8a8   : > { %v2675_v51 = vpop.f32.mrf.mxu1 }
 0x8a9   : > { %v2676_v27 = vadd.f32 %v2895_v57, %v2675_v51 }
 0x8ab   : > { %v2694_v31 = vadd.f32 %v2676_v27, %v3889_v22 }
 0x8ad   : > { %2702 = vst.msk [vmem:[%s386_s23 + $0x8] sm:$0xff] %vm398_vm0, %v2694_v31 }
 0x8bb   : > { %v2678_v24 = vpop.f32.mrf.mxu1 }
 0x8bc   : > { %v2679_v33 = vadd.f32 %v2895_v57, %v2678_v24 }
 0x8be   : > { %v2695_v35 = vadd.f32 %v2679_v33, %v3895_v47 }
 0x8c0   : > { %2703 = vst.msk [vmem:[%s386_s23 + $0x10] sm:$0xff] %vm398_vm0, %v2695_v35 }
 0x8c3   : > { %v2680_v41 = vpop.f32.mrf.mxu1 }
 0x8c4   : > { %v2681_v43 = vadd.f32 %v2895_v57, %v2680_v41 }
 0x8c6   : > { %v2696_v11 = vadd.f32 %v2681_v43, %v3901_v49 }
 0x8c8   : > { %2704 = vst.msk [vmem:[%s386_s23 + $0x18] sm:$0xff] %vm398_vm0, %v2696_v11 }
 0x8f9   : > { %v2683_v17 = vpop.f32.mrf.mxu1 }
 0x8fa   : > { %v2684_v0 = vadd.f32 %v2895_v57, %v2683_v17 }
 0x8fc   : > { %v2697_v56 = vadd.f32 %v2684_v0, %v3907_v16 }
 0x8fe   : > { %2705 = vst.msk [vmem:[%s386_s23 + $0x20] sm:$0xff] %vm398_vm0, %v2697_v56 }
 0x901   : > { %v2685_v22 = vpop.f32.mrf.mxu1 }
 0x902   : > { %v2686_v14 = vadd.f32 %v2895_v57, %v2685_v22 }
 0x904   : > { %v2698_v6 = vadd.f32 %v2686_v14, %v3913_v45 }
 0x906   : > { %2706 = vst.msk [vmem:[%s386_s23 + $0x28] sm:$0xff] %vm398_vm0, %v2698_v6 }
 0x91b   : > { %v2688_v47 = vpop.f32.mrf.mxu1 }
 0x91c   : > { %v2689_v18 = vadd.f32 %v2895_v57, %v2688_v47 }
 0x91e   : > { %v2699_v13 = vadd.f32 %v2689_v18, %v3919_v54 }
 0x920   : > { %2707 = vst.msk [vmem:[%s386_s23 + $0x30] sm:$0xff] %vm398_vm0, %v2699_v13 }
 0x923   : > { %v2690_v49 = vpop.f32.mrf.mxu1 }
 0x924   : > { %v2691_v58 = vadd.f32 %v2895_v57, %v2690_v49 }
 0x926   : > { %v2700_v55 = vadd.f32 %v2691_v58, %v3933_v19 }
 0x928   : > { %2708 = vst.msk [vmem:[%s386_s23 + $0x38] sm:$0xff] %vm398_vm0, %v2700_v55 }
 0x929 PF: > { %s21_s17 = sadd.s32 1, %s3040_s17  }
 0x92a   : > { %p18_p4 = scmp.ge.s32.totalorder %s21_s17, 4  }
 0x92c   :  { %20 = sbr.rel (!%p18_p4) target bundleno = 1 (0x1), region = 101 }

</bundles_post_ra>
